<compile_context>
chip_gen: v5e
topology: v5e:2x2
jax: 0.10.0
libtpu: 0.0.40
codegen_flags: <defaults>
</compile_context>

<pallas_src>
import functools

import jax
import jax.numpy as jnp
from jax import lax
from jax.experimental import pallas as pl
from jax.experimental.pallas import tpu as pltpu


def _round_up(x, m):
    return ((x + m - 1) // m) * m


def _rnn_kernel(x_ref, h0_ref, m0_ref, wx_ref, bih_ref, weff_ref, biasme_ref,
                wmT_ref, wembT_ref, bemb_ref,
                out_ref, hT_ref, mT_ref,
                z_sc, st_sc, *, activation, seq_len):
    t_blk, b_blk, hp = out_ref.shape
    i_dim = x_ref.shape[2]
    tb = pl.program_id(1)                      # time-block index ("arbitrary")
    cdt = x_ref.dtype                          # MXU compute dtype (f32 or bf16)
    f32 = jnp.float32

    act = jnp.tanh if activation == "tanh" else (lambda v: jnp.maximum(v, 0.0))

    # ---- cross-block state [h_{t-2}; h_{t-1}] lives in st_sc -----------------
    @pl.when(tb == 0)
    def _():
        h0 = h0_ref[...].astype(f32)
        st_sc[0] = h0                          # h_{-2} (never used, selected away)
        st_sc[1] = h0                          # h_{-1} = user h_0

    # ---- hoisted, non-recurrent projection for the whole time block ----------
    # Z[t] = x_t @ Wx^T + b_ih  — one big matmul, no sequential dependency.
    x2d = x_ref[...].reshape(t_blk * b_blk, i_dim)
    z2d = jnp.dot(x2d, wx_ref[...], preferred_element_type=f32) + bih_ref[...]
    z_sc[...] = z2d.reshape(t_blk, b_blk, hp)

    # ---- loop-invariant loads / broadcasts hoisted out of the unrolled loop --
    w_eff = weff_ref[...]                                     # (Hp, Hp)
    bias_me = jnp.broadcast_to(biasme_ref[...], (b_blk, hp))  # b_emb @ Wm^T
    # Prologue term for the very first timestep of the sequence (t == 0):
    r0 = jnp.dot(m0_ref[...].astype(cdt), wmT_ref[...],
                 preferred_element_type=f32)                  # m_0 @ Wm^T
    # TODO(synk): for very large H with tiny batch, keep W_eff resident in the
    # MXU across the block via pltpu.matmul_push_rhs/matmul_acc_lhs.

    # ---- recurrence; state carried in vregs (no per-step VMEM round-trip) ----
    def step(t, carry):
        h_tm2, h_tm1 = carry
        gt = tb * t_blk + t
        # Precomposed recurrence: h_t = act(z_t + h_{t-2} @ W_eff + b_emb@Wm^T).
        # Even/odd h-chains are independent -> consecutive steps overlap.
        r = jnp.dot(h_tm2.astype(cdt), w_eff,
                    preferred_element_type=f32) + bias_me
        r = jnp.where(gt == 0, r0, r)            # t == 0 uses the true m_0
        h_t = act(z_sc[t] + r)
        out_ref[t] = h_t.astype(out_ref.dtype)   # lane-dense store
        keep = gt < seq_len                      # freeze carry on padded tail steps
        return (jnp.where(keep, h_tm1, h_tm2), jnp.where(keep, h_t, h_tm1))

    h_a, h_b = lax.fori_loop(0, t_blk, step, (st_sc[0], st_sc[1]), unroll=True)

    # Write the carry back once per block (not once per step).
    st_sc[0] = h_a
    st_sc[1] = h_b

    # ---- final state ----------------------------------------------------------
    @pl.when(tb == pl.num_programs(1) - 1)
    def _():
        hT_ref[...] = h_b.astype(hT_ref.dtype)                  # h_{S-1}
        # m_{S-1} = h_{S-2} @ Wemb^T + b_emb, reconstructed once at the end.
        m_fin = jnp.dot(h_a.astype(cdt), wembT_ref[...],
                        preferred_element_type=f32) + bemb_ref[...]
        mT_ref[...] = m_fin.astype(mT_ref.dtype)


def custom_rnn_pallas(input_seq, params, h_0=None, m_0=None, *,
                      activation="tanh",
                      compute_dtype=jnp.float32,
                      t_block_cap=64,
                      vmem_budget_bytes=64 * 1024 * 1024):
    """input_seq: (seq_len, batch, input_size) -> (outputs, h_T, m_T)."""
    if activation not in ("tanh", "relu"):
        raise ValueError("Unsupported activation function")

    S, B, I = input_seq.shape
    w_emb, b_emb, w_ih, b_ih = (params["w_emb"], params["b_emb"],
                                params["w_ih"], params["b_ih"])
    E, H = w_emb.shape                                    # torch Linear: (out, in)
    assert w_ih.shape == (H, I + E)

    out_dtype = input_seq.dtype
    f32 = jnp.float32
    cdt = jnp.dtype(compute_dtype)

    # Lane-dense features, sublane-dense batch.
    Bp = _round_up(max(B, 8), 8)
    Hp = _round_up(H, 128)
    Ep = _round_up(E, 128)

    # Optional batch-parallel grid axis: lets v7x's second TensorCore work on the
    # other half of a large batch (single block — a no-op — for small batches).
    B_BLK = Bp // 2 if (Bp % 16 == 0 and Bp >= 16) else Bp
    n_bblk = Bp // B_BLK

    # --- explicit VMEM accounting; choose the time-block size against a budget -
    csz = cdt.itemsize
    osz = jnp.dtype(out_dtype).itemsize

    def est_vmem(t_blk):
        e = 2 * t_blk * B_BLK * I * csz                   # x block (2x buffered)
        e += 2 * t_blk * B_BLK * Hp * osz                 # out block (2x buffered)
        e += 2 * B_BLK * (Hp + Ep) * osz                  # hT / mT blocks
        e += 2 * B_BLK * (Hp + Ep) * 4                    # h0 / m0
        e += 2 * ((I * Hp + Ep * Hp + Hp * Hp + Hp * Ep) * csz
                  + (2 * Hp + Ep) * 4)                    # weights + biases
        e += t_blk * B_BLK * Hp * 4                       # hoisted Z scratch
        e += 2 * B_BLK * Hp * 4                           # state scratch
        return e

    T_BLK = max(1, min(int(t_block_cap), S))
    while T_BLK > 1 and est_vmem(T_BLK) > vmem_budget_bytes:
        T_BLK = max(1, T_BLK // 2)
    n_tblk = -(-S // T_BLK)                               # ceil-div
    S_pad = n_tblk * T_BLK                                # no divisor cliff for prime S
    vmem_limit = int(min(max(est_vmem(T_BLK) + (4 << 20), 32 << 20),
                         max(vmem_budget_bytes, 32 << 20)))

    # --- padded / cast operands (x kept in compute dtype: no f32 upcast copy) --
    x_pad = jnp.zeros((S_pad, Bp, I), cdt).at[:S, :B, :].set(input_seq.astype(cdt))
    h0 = jnp.zeros((B, H), f32) if h_0 is None else h_0.astype(f32)
    m0 = jnp.zeros((B, E), f32) if m_0 is None else m_0.astype(f32)
    h0_pad = jnp.zeros((Bp, Hp), f32).at[:B, :H].set(h0)
    m0_pad = jnp.zeros((Bp, Ep), f32).at[:B, :E].set(m0)

    # --- weights: precomposed recurrence -----------------------------------------
    #   m_t = h_{t-1}@Wemb^T + b_emb ;  h_t = act(x_t@Wx^T + m_{t-1}@Wm^T + b_ih)
    #   => t >= 1:  h_t = act(z_t + h_{t-2} @ W_eff + b_emb @ Wm^T),
    #      W_eff = Wemb^T @ Wm^T (HxH);  t == 0 uses the supplied m_0 directly.
    hi = lax.Precision.HIGHEST
    wx = w_ih[:, :I].T.astype(f32)                        # (I, H)
    wm_t = w_ih[:, I:].T.astype(f32)                      # (E, H)
    wemb_t = w_emb.T.astype(f32)                          # (H, E)
    w_eff = jnp.dot(wemb_t, wm_t, precision=hi)           # (H, H)
    bias_me = jnp.dot(b_emb.astype(f32)[None, :], wm_t, precision=hi)  # (1, H)

    wx_pad = jnp.zeros((I, Hp), cdt).at[:, :H].set(wx.astype(cdt))
    wmT_pad = jnp.zeros((Ep, Hp), cdt).at[:E, :H].set(wm_t.astype(cdt))
    wembT_pad = jnp.zeros((Hp, Ep), cdt).at[:H, :E].set(wemb_t.astype(cdt))
    weff_pad = jnp.zeros((Hp, Hp), cdt).at[:H, :H].set(w_eff.astype(cdt))
    bih_pad = jnp.zeros((1, Hp), f32).at[0, :H].set(b_ih.astype(f32))
    biasme_pad = jnp.zeros((1, Hp), f32).at[:, :H].set(bias_me)
    bemb_pad = jnp.zeros((1, Ep), f32).at[0, :E].set(b_emb.astype(f32))

    kernel = functools.partial(_rnn_kernel, activation=activation, seq_len=S)

    out_shapes = (
        jax.ShapeDtypeStruct((S_pad, Bp, Hp), out_dtype),  # per-step h (padded)
        jax.ShapeDtypeStruct((Bp, Hp), out_dtype),         # final h (padded)
        jax.ShapeDtypeStruct((Bp, Ep), out_dtype),         # final m (padded)
    )

    def _run(single_buffer_consts):
        def _const(shape):
            idx = lambda bb, tb: (0,) * len(shape)
            if single_buffer_consts:
                # Constant-index operands: double-buffering only wastes VMEM.
                return pl.BlockSpec(shape, idx, pipeline_mode=pl.Buffered(1))
            return pl.BlockSpec(shape, idx)

        def _batch_const(shape):
            idx = lambda bb, tb: (bb,) + (0,) * (len(shape) - 1)
            if single_buffer_consts:
                return pl.BlockSpec(shape, idx, pipeline_mode=pl.Buffered(1))
            return pl.BlockSpec(shape, idx)

        grid_spec = pltpu.PrefetchScalarGridSpec(
            num_scalar_prefetch=0,
            grid=(n_bblk, n_tblk),
            in_specs=[
                pl.BlockSpec((T_BLK, B_BLK, I), lambda bb, tb: (tb, bb, 0)),  # x
                _batch_const((B_BLK, Hp)),                                    # h_0
                _batch_const((B_BLK, Ep)),                                    # m_0
                _const((I, Hp)),                                              # Wx^T
                _const((1, Hp)),                                              # b_ih
                _const((Hp, Hp)),                                             # W_eff
                _const((1, Hp)),                                              # b_emb@Wm^T
                _const((Ep, Hp)),                                             # Wm^T
                _const((Hp, Ep)),                                             # Wemb^T
                _const((1, Ep)),                                              # b_emb
            ],
            out_specs=[
                pl.BlockSpec((T_BLK, B_BLK, Hp), lambda bb, tb: (tb, bb, 0)),
                pl.BlockSpec((B_BLK, Hp), lambda bb, tb: (bb, 0)),
                pl.BlockSpec((B_BLK, Ep), lambda bb, tb: (bb, 0)),
            ],
            scratch_shapes=[
                pltpu.VMEM((T_BLK, B_BLK, Hp), jnp.float32),   # hoisted Z block
                pltpu.VMEM((2, B_BLK, Hp), jnp.float32),       # [h_{t-2}; h_{t-1}]
            ],
        )
        return pl.pallas_call(
            kernel,
            out_shape=out_shapes,
            grid_spec=grid_spec,
            compiler_params=pltpu.CompilerParams(
                # Batch blocks are independent ("parallel": 2nd TC on v7x);
                # time is a true recurrence ("arbitrary": sequential).
                dimension_semantics=("parallel", "arbitrary"),
                vmem_limit_bytes=vmem_limit,
            ),
        )(x_pad, h0_pad, m0_pad, wx_pad, bih_pad, weff_pad, biasme_pad,
          wmT_pad, wembT_pad, bemb_pad)

    try:
        out_pad, hT_pad, mT_pad = _run(True)
    except Exception:
        # pl.Buffered(1) unsupported on this JAX build -> default buffering.
        out_pad, hT_pad, mT_pad = _run(False)

    # Strip padding.  (If the consumer tolerates padded slabs, return them
    # directly to avoid the extra HBM pass / write amplification.)
    return out_pad[:S, :B, :H], hT_pad[:B, :H], mT_pad[:B, :E]


def custom_rnn_ref(input_seq, params, h_0=None, m_0=None, activation="tanh"):
    """Pure-JAX reference matching the PyTorch module step-for-step."""
    S, B, I = input_seq.shape
    w_emb, b_emb, w_ih, b_ih = (params["w_emb"], params["b_emb"],
                                params["w_ih"], params["b_ih"])
    E, H = w_emb.shape
    act = jnp.tanh if activation == "tanh" else (lambda v: jnp.maximum(v, 0.0))
    h = jnp.zeros((B, H), input_seq.dtype) if h_0 is None else h_0
    m = jnp.zeros((B, E), input_seq.dtype) if m_0 is None else m_0
    outs = []
    for t in range(S):
        x_t = input_seq[t]
        m_new = h @ w_emb.T + b_emb
        combined = jnp.concatenate([x_t, m], axis=1)
        h = act(combined @ w_ih.T + b_ih)
        m = m_new
        outs.append(h[None])
    return jnp.concatenate(outs, axis=0), h, m


def init_params(key, input_size, hidden_size, embed_size):
    k1, k2, k3, k4 = jax.random.split(key, 4)
    s_emb = 1.0 / jnp.sqrt(hidden_size * 1.0)
    s_ih = 1.0 / jnp.sqrt((input_size + embed_size) * 1.0)
    return {
        "w_emb": jax.random.uniform(k1, (embed_size, hidden_size),
                                    jnp.float32, -s_emb, s_emb),
        "b_emb": jax.random.uniform(k2, (embed_size,),
                                    jnp.float32, -s_emb, s_emb),
        "w_ih": jax.random.uniform(k3, (hidden_size, input_size + embed_size),
                                   jnp.float32, -s_ih, s_ih),
        "b_ih": jax.random.uniform(k4, (hidden_size,),
                                   jnp.float32, -s_ih, s_ih),
    }


if __name__ == "__main__":
    INPUT, HIDDEN, EMBED = 8, 32, 16
    key = jax.random.PRNGKey(0)
    keys = jax.random.split(key, 6)

    def run_case(seq, batch, compute_dtype, t_block_cap, atol, rtol, kx, kp):
        x = jax.random.normal(kx, (seq, batch, INPUT), jnp.float32)
        params = init_params(kp, INPUT, HIDDEN, EMBED)
        outs, h_T, m_T = custom_rnn_pallas(x, params,
                                           compute_dtype=compute_dtype,
                                           t_block_cap=t_block_cap)
        jax.block_until_ready((outs, h_T, m_T))
        r_o, r_h, r_m = custom_rnn_ref(x, params)
        assert outs.shape == (seq, batch, HIDDEN)
        assert h_T.shape == (batch, HIDDEN) and m_T.shape == (batch, EMBED)
        assert jnp.allclose(outs, r_o, atol=atol, rtol=rtol)
        assert jnp.allclose(h_T, r_h, atol=atol, rtol=rtol)
        assert jnp.allclose(m_T, r_m, atol=atol, rtol=rtol)

    # f32 MXU path, standard small shape (seq=8, batch=2).
    run_case(8, 2, jnp.float32, 64, 1e-4, 1e-4, keys[0], keys[1])
    # Awkward seq/batch: exercises seq padding + in-kernel tail masking.
    run_case(7, 3, jnp.float32, 4, 1e-4, 1e-4, keys[2], keys[3])
    # bf16 MXU path (f32 state / accumulation) — looser tolerance.
    run_case(8, 2, jnp.bfloat16, 64, 6e-2, 5e-2, keys[4], keys[5])

    print("KERNEL_OK")
</pallas_src>

<mosaic_0001>
module attributes {stable_mosaic.version = 11 : i64} {
  func.func @_rnn_kernel(%arg0: i32, %arg1: i32, %arg2: memref<8x8x8xf32, #tpu.memory_space<vmem>>, %arg3: memref<8x128xf32, #tpu.memory_space<vmem>>, %arg4: memref<8x128xf32, #tpu.memory_space<vmem>>, %arg5: memref<8x128xf32, #tpu.memory_space<vmem>>, %arg6: memref<1x128xf32, #tpu.memory_space<vmem>>, %arg7: memref<128x128xf32, #tpu.memory_space<vmem>>, %arg8: memref<1x128xf32, #tpu.memory_space<vmem>>, %arg9: memref<128x128xf32, #tpu.memory_space<vmem>>, %arg10: memref<128x128xf32, #tpu.memory_space<vmem>>, %arg11: memref<1x128xf32, #tpu.memory_space<vmem>>, %arg12: memref<8x8x128xf32, #tpu.memory_space<vmem>>, %arg13: memref<8x128xf32, #tpu.memory_space<vmem>>, %arg14: memref<8x128xf32, #tpu.memory_space<vmem>>, %arg15: memref<8x8x128xf32, #tpu.memory_space<vmem>>, %arg16: memref<2x8x128xf32, #tpu.memory_space<vmem>>) attributes {dimension_semantics = [#tpu.dimension_semantics<parallel>, #tpu.dimension_semantics<arbitrary>], iteration_bounds = array<i64: 1, 1>, scalar_prefetch = 0 : i64, scratch_operands = 2 : i64, tpu.core_type = #tpu.core_type<tc>, window_params = [{transform_indices = @transform_0, window_bounds = array<i64: 8, 8, 8>}, {pipeline_mode = #tpu.pipeline_mode<synchronous>, transform_indices = @transform_1, window_bounds = array<i64: 8, 128>}, {pipeline_mode = #tpu.pipeline_mode<synchronous>, transform_indices = @transform_2, window_bounds = array<i64: 8, 128>}, {pipeline_mode = #tpu.pipeline_mode<synchronous>, transform_indices = @transform_3, window_bounds = array<i64: 8, 128>}, {pipeline_mode = #tpu.pipeline_mode<synchronous>, transform_indices = @transform_4, window_bounds = array<i64: 1, 128>}, {pipeline_mode = #tpu.pipeline_mode<synchronous>, transform_indices = @transform_5, window_bounds = array<i64: 128, 128>}, {pipeline_mode = #tpu.pipeline_mode<synchronous>, transform_indices = @transform_6, window_bounds = array<i64: 1, 128>}, {pipeline_mode = #tpu.pipeline_mode<synchronous>, transform_indices = @transform_7, window_bounds = array<i64: 128, 128>}, {pipeline_mode = #tpu.pipeline_mode<synchronous>, transform_indices = @transform_8, window_bounds = array<i64: 128, 128>}, {pipeline_mode = #tpu.pipeline_mode<synchronous>, transform_indices = @transform_9, window_bounds = array<i64: 1, 128>}, {transform_indices = @transform_10, window_bounds = array<i64: 8, 8, 128>}, {transform_indices = @transform_11, window_bounds = array<i64: 8, 128>}, {transform_indices = @transform_12, window_bounds = array<i64: 8, 128>}]} {
    %c0_i32 = arith.constant 0 : i32
    %0 = arith.cmpi eq, %arg1, %c0_i32 : i32
    %1 = arith.extui %0 : i1 to i32
    %c0_i32_0 = arith.constant 0 : i32
    %2 = arith.cmpi ne, %1, %c0_i32_0 : i32
    scf.if %2 {
      %c0_97 = arith.constant 0 : index
      %c0_98 = arith.constant 0 : index
      %176 = vector.load %arg3[%c0_97, %c0_98] : memref<8x128xf32, #tpu.memory_space<vmem>>, vector<8x128xf32>
      %c0_99 = arith.constant 0 : index
      %c0_100 = arith.constant 0 : index
      %c0_101 = arith.constant 0 : index
      %177 = vector.load %arg16[%c0_99, %c0_100, %c0_101] : memref<2x8x128xf32, #tpu.memory_space<vmem>>, vector<1x8x128xf32>
      %178 = vector.shape_cast %177 : vector<1x8x128xf32> to vector<8x128xf32>
      %179 = vector.shape_cast %176 : vector<8x128xf32> to vector<1x8x128xf32>
      tpu.vector_store %arg16[%c0_99, %c0_100, %c0_101], %179 {strides = array<i32>} : memref<2x8x128xf32, #tpu.memory_space<vmem>>, vector<1x8x128xf32>,
      %c1_102 = arith.constant 1 : index
      %c0_103 = arith.constant 0 : index
      %c0_104 = arith.constant 0 : index
      %180 = vector.load %arg16[%c1_102, %c0_103, %c0_104] : memref<2x8x128xf32, #tpu.memory_space<vmem>>, vector<1x8x128xf32>
      %181 = vector.shape_cast %180 : vector<1x8x128xf32> to vector<8x128xf32>
      %182 = vector.shape_cast %176 : vector<8x128xf32> to vector<1x8x128xf32>
      tpu.vector_store %arg16[%c1_102, %c0_103, %c0_104], %182 {strides = array<i32>} : memref<2x8x128xf32, #tpu.memory_space<vmem>>, vector<1x8x128xf32>,
    } else {
    }
    %c0 = arith.constant 0 : index
    %c0_1 = arith.constant 0 : index
    %c0_2 = arith.constant 0 : index
    %3 = vector.load %arg2[%c0, %c0_1, %c0_2] : memref<8x8x8xf32, #tpu.memory_space<vmem>>, vector<8x8x8xf32>
    %4 = vector.shape_cast %3 : vector<8x8x8xf32> to vector<64x8xf32>
    %c0_3 = arith.constant 0 : index
    %c0_4 = arith.constant 0 : index
    %5 = vector.load %arg5[%c0_3, %c0_4] : memref<8x128xf32, #tpu.memory_space<vmem>>, vector<8x128xf32>
    %cst = arith.constant dense<0.000000e+00> : vector<64x128xf32>
    %6 = tpu.matmul %4, %5, %cst {dimension_numbers = #tpu.dot_dimension_numbers<[1], [0], [0], [1], [0, 0, 1, 1], [], []>} : vector<64x8xf32>, vector<8x128xf32>, vector<64x128xf32> -> vector<64x128xf32>
    %c0_5 = arith.constant 0 : index
    %c0_6 = arith.constant 0 : index
    %7 = vector.load %arg6[%c0_5, %c0_6] : memref<1x128xf32, #tpu.memory_space<vmem>>, vector<1x128xf32>
    %8 = vector.broadcast %7 : vector<1x128xf32> to vector<64x128xf32>
    %9 = arith.addf %6, %8 : vector<64x128xf32>
    %10 = vector.shape_cast %9 : vector<64x128xf32> to vector<8x8x128xf32>
    %c0_7 = arith.constant 0 : index
    %c0_8 = arith.constant 0 : index
    %c0_9 = arith.constant 0 : index
    %11 = vector.load %arg15[%c0_7, %c0_8, %c0_9] : memref<8x8x128xf32, #tpu.memory_space<vmem>>, vector<8x8x128xf32>
    tpu.vector_store %arg15[%c0_7, %c0_8, %c0_9], %10 {strides = array<i32>} : memref<8x8x128xf32, #tpu.memory_space<vmem>>, vector<8x8x128xf32>,
    %c0_10 = arith.constant 0 : index
    %c0_11 = arith.constant 0 : index
    %12 = vector.load %arg7[%c0_10, %c0_11] : memref<128x128xf32, #tpu.memory_space<vmem>>, vector<128x128xf32>
    %c0_12 = arith.constant 0 : index
    %c0_13 = arith.constant 0 : index
    %13 = vector.load %arg8[%c0_12, %c0_13] : memref<1x128xf32, #tpu.memory_space<vmem>>, vector<1x128xf32>
    %14 = vector.shape_cast %13 : vector<1x128xf32> to vector<1x128xf32>
    %15 = vector.broadcast %14 : vector<1x128xf32> to vector<8x128xf32>
    %c0_14 = arith.constant 0 : index
    %c0_15 = arith.constant 0 : index
    %16 = vector.load %arg4[%c0_14, %c0_15] : memref<8x128xf32, #tpu.memory_space<vmem>>, vector<8x128xf32>
    %c0_16 = arith.constant 0 : index
    %c0_17 = arith.constant 0 : index
    %17 = vector.load %arg9[%c0_16, %c0_17] : memref<128x128xf32, #tpu.memory_space<vmem>>, vector<128x128xf32>
    %cst_18 = arith.constant dense<0.000000e+00> : vector<8x128xf32>
    %18 = tpu.matmul %16, %17, %cst_18 {dimension_numbers = #tpu.dot_dimension_numbers<[1], [0], [0], [1], [0, 0, 1, 1], [], []>} : vector<8x128xf32>, vector<128x128xf32>, vector<8x128xf32> -> vector<8x128xf32>
    %c0_19 = arith.constant 0 : index
    %c0_20 = arith.constant 0 : index
    %c0_21 = arith.constant 0 : index
    %19 = vector.load %arg16[%c0_19, %c0_20, %c0_21] : memref<2x8x128xf32, #tpu.memory_space<vmem>>, vector<1x8x128xf32>
    %20 = vector.shape_cast %19 : vector<1x8x128xf32> to vector<8x128xf32>
    %c1 = arith.constant 1 : index
    %c0_22 = arith.constant 0 : index
    %c0_23 = arith.constant 0 : index
    %21 = vector.load %arg16[%c1, %c0_22, %c0_23] : memref<2x8x128xf32, #tpu.memory_space<vmem>>, vector<1x8x128xf32>
    %22 = vector.shape_cast %21 : vector<1x8x128xf32> to vector<8x128xf32>
    %c0_i32_24 = arith.constant 0 : i32
    %c8_i32 = arith.constant 8 : i32
    %23 = arith.muli %arg1, %c8_i32 : i32
    %24 = arith.addi %23, %c0_i32_24 : i32
    %cst_25 = arith.constant dense<0.000000e+00> : vector<8x128xf32>
    %25 = tpu.matmul %20, %12, %cst_25 {dimension_numbers = #tpu.dot_dimension_numbers<[1], [0], [0], [1], [0, 0, 1, 1], [], []>} : vector<8x128xf32>, vector<128x128xf32>, vector<8x128xf32> -> vector<8x128xf32>
    %26 = arith.addf %25, %15 : vector<8x128xf32>
    %c0_i32_26 = arith.constant 0 : i32
    %27 = arith.cmpi eq, %24, %c0_i32_26 : i32
    %28 = arith.select %27, %18, %26 : vector<8x128xf32>
    %29 = arith.index_cast %c0_i32_24 : i32 to index
    %c0_27 = arith.constant 0 : index
    %c0_28 = arith.constant 0 : index
    %30 = vector.load %arg15[%29, %c0_27, %c0_28] : memref<8x8x128xf32, #tpu.memory_space<vmem>>, vector<1x8x128xf32>
    %31 = vector.shape_cast %30 : vector<1x8x128xf32> to vector<8x128xf32>
    %32 = arith.addf %31, %28 : vector<8x128xf32>
    %33 = math.tanh %32 : vector<8x128xf32>
    %34 = arith.index_cast %c0_i32_24 : i32 to index
    %c0_29 = arith.constant 0 : index
    %c0_30 = arith.constant 0 : index
    %35 = vector.load %arg12[%34, %c0_29, %c0_30] : memref<8x8x128xf32, #tpu.memory_space<vmem>>, vector<1x8x128xf32>
    %36 = vector.shape_cast %35 : vector<1x8x128xf32> to vector<8x128xf32>
    %37 = vector.shape_cast %33 : vector<8x128xf32> to vector<1x8x128xf32>
    tpu.vector_store %arg12[%34, %c0_29, %c0_30], %37 {strides = array<i32>} : memref<8x8x128xf32, #tpu.memory_space<vmem>>, vector<1x8x128xf32>,
    %c8_i32_31 = arith.constant 8 : i32
    %38 = arith.cmpi slt, %24, %c8_i32_31 : i32
    %39 = arith.select %38, %22, %20 : vector<8x128xf32>
    %40 = arith.select %38, %33, %22 : vector<8x128xf32>
    %c1_i32 = arith.constant 1 : i32
    %c8_i32_32 = arith.constant 8 : i32
    %41 = arith.muli %arg1, %c8_i32_32 : i32
    %42 = arith.addi %41, %c1_i32 : i32
    %cst_33 = arith.constant dense<0.000000e+00> : vector<8x128xf32>
    %43 = tpu.matmul %39, %12, %cst_33 {dimension_numbers = #tpu.dot_dimension_numbers<[1], [0], [0], [1], [0, 0, 1, 1], [], []>} : vector<8x128xf32>, vector<128x128xf32>, vector<8x128xf32> -> vector<8x128xf32>
    %44 = arith.addf %43, %15 : vector<8x128xf32>
    %c0_i32_34 = arith.constant 0 : i32
    %45 = arith.cmpi eq, %42, %c0_i32_34 : i32
    %46 = arith.select %45, %18, %44 : vector<8x128xf32>
    %47 = arith.index_cast %c1_i32 : i32 to index
    %c0_35 = arith.constant 0 : index
    %c0_36 = arith.constant 0 : index
    %48 = vector.load %arg15[%47, %c0_35, %c0_36] : memref<8x8x128xf32, #tpu.memory_space<vmem>>, vector<1x8x128xf32>
    %49 = vector.shape_cast %48 : vector<1x8x128xf32> to vector<8x128xf32>
    %50 = arith.addf %49, %46 : vector<8x128xf32>
    %51 = math.tanh %50 : vector<8x128xf32>
    %52 = arith.index_cast %c1_i32 : i32 to index
    %c0_37 = arith.constant 0 : index
    %c0_38 = arith.constant 0 : index
    %53 = vector.load %arg12[%52, %c0_37, %c0_38] : memref<8x8x128xf32, #tpu.memory_space<vmem>>, vector<1x8x128xf32>
    %54 = vector.shape_cast %53 : vector<1x8x128xf32> to vector<8x128xf32>
    %55 = vector.shape_cast %51 : vector<8x128xf32> to vector<1x8x128xf32>
    tpu.vector_store %arg12[%52, %c0_37, %c0_38], %55 {strides = array<i32>} : memref<8x8x128xf32, #tpu.memory_space<vmem>>, vector<1x8x128xf32>,
    %c8_i32_39 = arith.constant 8 : i32
    %56 = arith.cmpi slt, %42, %c8_i32_39 : i32
    %57 = arith.select %56, %40, %39 : vector<8x128xf32>
    %58 = arith.select %56, %51, %40 : vector<8x128xf32>
    %c2_i32 = arith.constant 2 : i32
    %c8_i32_40 = arith.constant 8 : i32
    %59 = arith.muli %arg1, %c8_i32_40 : i32
    %60 = arith.addi %59, %c2_i32 : i32
    %cst_41 = arith.constant dense<0.000000e+00> : vector<8x128xf32>
    %61 = tpu.matmul %57, %12, %cst_41 {dimension_numbers = #tpu.dot_dimension_numbers<[1], [0], [0], [1], [0, 0, 1, 1], [], []>} : vector<8x128xf32>, vector<128x128xf32>, vector<8x128xf32> -> vector<8x128xf32>
    %62 = arith.addf %61, %15 : vector<8x128xf32>
    %c0_i32_42 = arith.constant 0 : i32
    %63 = arith.cmpi eq, %60, %c0_i32_42 : i32
    %64 = arith.select %63, %18, %62 : vector<8x128xf32>
    %65 = arith.index_cast %c2_i32 : i32 to index
    %c0_43 = arith.constant 0 : index
    %c0_44 = arith.constant 0 : index
    %66 = vector.load %arg15[%65, %c0_43, %c0_44] : memref<8x8x128xf32, #tpu.memory_space<vmem>>, vector<1x8x128xf32>
    %67 = vector.shape_cast %66 : vector<1x8x128xf32> to vector<8x128xf32>
    %68 = arith.addf %67, %64 : vector<8x128xf32>
    %69 = math.tanh %68 : vector<8x128xf32>
    %70 = arith.index_cast %c2_i32 : i32 to index
    %c0_45 = arith.constant 0 : index
    %c0_46 = arith.constant 0 : index
    %71 = vector.load %arg12[%70, %c0_45, %c0_46] : memref<8x8x128xf32, #tpu.memory_space<vmem>>, vector<1x8x128xf32>
    %72 = vector.shape_cast %71 : vector<1x8x128xf32> to vector<8x128xf32>
    %73 = vector.shape_cast %69 : vector<8x128xf32> to vector<1x8x128xf32>
    tpu.vector_store %arg12[%70, %c0_45, %c0_46], %73 {strides = array<i32>} : memref<8x8x128xf32, #tpu.memory_space<vmem>>, vector<1x8x128xf32>,
    %c8_i32_47 = arith.constant 8 : i32
    %74 = arith.cmpi slt, %60, %c8_i32_47 : i32
    %75 = arith.select %74, %58, %57 : vector<8x128xf32>
    %76 = arith.select %74, %69, %58 : vector<8x128xf32>
    %c3_i32 = arith.constant 3 : i32
    %c8_i32_48 = arith.constant 8 : i32
    %77 = arith.muli %arg1, %c8_i32_48 : i32
    %78 = arith.addi %77, %c3_i32 : i32
    %cst_49 = arith.constant dense<0.000000e+00> : vector<8x128xf32>
    %79 = tpu.matmul %75, %12, %cst_49 {dimension_numbers = #tpu.dot_dimension_numbers<[1], [0], [0], [1], [0, 0, 1, 1], [], []>} : vector<8x128xf32>, vector<128x128xf32>, vector<8x128xf32> -> vector<8x128xf32>
    %80 = arith.addf %79, %15 : vector<8x128xf32>
    %c0_i32_50 = arith.constant 0 : i32
    %81 = arith.cmpi eq, %78, %c0_i32_50 : i32
    %82 = arith.select %81, %18, %80 : vector<8x128xf32>
    %83 = arith.index_cast %c3_i32 : i32 to index
    %c0_51 = arith.constant 0 : index
    %c0_52 = arith.constant 0 : index
    %84 = vector.load %arg15[%83, %c0_51, %c0_52] : memref<8x8x128xf32, #tpu.memory_space<vmem>>, vector<1x8x128xf32>
    %85 = vector.shape_cast %84 : vector<1x8x128xf32> to vector<8x128xf32>
    %86 = arith.addf %85, %82 : vector<8x128xf32>
    %87 = math.tanh %86 : vector<8x128xf32>
    %88 = arith.index_cast %c3_i32 : i32 to index
    %c0_53 = arith.constant 0 : index
    %c0_54 = arith.constant 0 : index
    %89 = vector.load %arg12[%88, %c0_53, %c0_54] : memref<8x8x128xf32, #tpu.memory_space<vmem>>, vector<1x8x128xf32>
    %90 = vector.shape_cast %89 : vector<1x8x128xf32> to vector<8x128xf32>
    %91 = vector.shape_cast %87 : vector<8x128xf32> to vector<1x8x128xf32>
    tpu.vector_store %arg12[%88, %c0_53, %c0_54], %91 {strides = array<i32>} : memref<8x8x128xf32, #tpu.memory_space<vmem>>, vector<1x8x128xf32>,
    %c8_i32_55 = arith.constant 8 : i32
    %92 = arith.cmpi slt, %78, %c8_i32_55 : i32
    %93 = arith.select %92, %76, %75 : vector<8x128xf32>
    %94 = arith.select %92, %87, %76 : vector<8x128xf32>
    %c4_i32 = arith.constant 4 : i32
    %c8_i32_56 = arith.constant 8 : i32
    %95 = arith.muli %arg1, %c8_i32_56 : i32
    %96 = arith.addi %95, %c4_i32 : i32
    %cst_57 = arith.constant dense<0.000000e+00> : vector<8x128xf32>
    %97 = tpu.matmul %93, %12, %cst_57 {dimension_numbers = #tpu.dot_dimension_numbers<[1], [0], [0], [1], [0, 0, 1, 1], [], []>} : vector<8x128xf32>, vector<128x128xf32>, vector<8x128xf32> -> vector<8x128xf32>
    %98 = arith.addf %97, %15 : vector<8x128xf32>
    %c0_i32_58 = arith.constant 0 : i32
    %99 = arith.cmpi eq, %96, %c0_i32_58 : i32
    %100 = arith.select %99, %18, %98 : vector<8x128xf32>
    %101 = arith.index_cast %c4_i32 : i32 to index
    %c0_59 = arith.constant 0 : index
    %c0_60 = arith.constant 0 : index
    %102 = vector.load %arg15[%101, %c0_59, %c0_60] : memref<8x8x128xf32, #tpu.memory_space<vmem>>, vector<1x8x128xf32>
    %103 = vector.shape_cast %102 : vector<1x8x128xf32> to vector<8x128xf32>
    %104 = arith.addf %103, %100 : vector<8x128xf32>
    %105 = math.tanh %104 : vector<8x128xf32>
    %106 = arith.index_cast %c4_i32 : i32 to index
    %c0_61 = arith.constant 0 : index
    %c0_62 = arith.constant 0 : index
    %107 = vector.load %arg12[%106, %c0_61, %c0_62] : memref<8x8x128xf32, #tpu.memory_space<vmem>>, vector<1x8x128xf32>
    %108 = vector.shape_cast %107 : vector<1x8x128xf32> to vector<8x128xf32>
    %109 = vector.shape_cast %105 : vector<8x128xf32> to vector<1x8x128xf32>
    tpu.vector_store %arg12[%106, %c0_61, %c0_62], %109 {strides = array<i32>} : memref<8x8x128xf32, #tpu.memory_space<vmem>>, vector<1x8x128xf32>,
    %c8_i32_63 = arith.constant 8 : i32
    %110 = arith.cmpi slt, %96, %c8_i32_63 : i32
    %111 = arith.select %110, %94, %93 : vector<8x128xf32>
    %112 = arith.select %110, %105, %94 : vector<8x128xf32>
    %c5_i32 = arith.constant 5 : i32
    %c8_i32_64 = arith.constant 8 : i32
    %113 = arith.muli %arg1, %c8_i32_64 : i32
    %114 = arith.addi %113, %c5_i32 : i32
    %cst_65 = arith.constant dense<0.000000e+00> : vector<8x128xf32>
    %115 = tpu.matmul %111, %12, %cst_65 {dimension_numbers = #tpu.dot_dimension_numbers<[1], [0], [0], [1], [0, 0, 1, 1], [], []>} : vector<8x128xf32>, vector<128x128xf32>, vector<8x128xf32> -> vector<8x128xf32>
    %116 = arith.addf %115, %15 : vector<8x128xf32>
    %c0_i32_66 = arith.constant 0 : i32
    %117 = arith.cmpi eq, %114, %c0_i32_66 : i32
    %118 = arith.select %117, %18, %116 : vector<8x128xf32>
    %119 = arith.index_cast %c5_i32 : i32 to index
    %c0_67 = arith.constant 0 : index
    %c0_68 = arith.constant 0 : index
    %120 = vector.load %arg15[%119, %c0_67, %c0_68] : memref<8x8x128xf32, #tpu.memory_space<vmem>>, vector<1x8x128xf32>
    %121 = vector.shape_cast %120 : vector<1x8x128xf32> to vector<8x128xf32>
    %122 = arith.addf %121, %118 : vector<8x128xf32>
    %123 = math.tanh %122 : vector<8x128xf32>
    %124 = arith.index_cast %c5_i32 : i32 to index
    %c0_69 = arith.constant 0 : index
    %c0_70 = arith.constant 0 : index
    %125 = vector.load %arg12[%124, %c0_69, %c0_70] : memref<8x8x128xf32, #tpu.memory_space<vmem>>, vector<1x8x128xf32>
    %126 = vector.shape_cast %125 : vector<1x8x128xf32> to vector<8x128xf32>
    %127 = vector.shape_cast %123 : vector<8x128xf32> to vector<1x8x128xf32>
    tpu.vector_store %arg12[%124, %c0_69, %c0_70], %127 {strides = array<i32>} : memref<8x8x128xf32, #tpu.memory_space<vmem>>, vector<1x8x128xf32>,
    %c8_i32_71 = arith.constant 8 : i32
    %128 = arith.cmpi slt, %114, %c8_i32_71 : i32
    %129 = arith.select %128, %112, %111 : vector<8x128xf32>
    %130 = arith.select %128, %123, %112 : vector<8x128xf32>
    %c6_i32 = arith.constant 6 : i32
    %c8_i32_72 = arith.constant 8 : i32
    %131 = arith.muli %arg1, %c8_i32_72 : i32
    %132 = arith.addi %131, %c6_i32 : i32
    %cst_73 = arith.constant dense<0.000000e+00> : vector<8x128xf32>
    %133 = tpu.matmul %129, %12, %cst_73 {dimension_numbers = #tpu.dot_dimension_numbers<[1], [0], [0], [1], [0, 0, 1, 1], [], []>} : vector<8x128xf32>, vector<128x128xf32>, vector<8x128xf32> -> vector<8x128xf32>
    %134 = arith.addf %133, %15 : vector<8x128xf32>
    %c0_i32_74 = arith.constant 0 : i32
    %135 = arith.cmpi eq, %132, %c0_i32_74 : i32
    %136 = arith.select %135, %18, %134 : vector<8x128xf32>
    %137 = arith.index_cast %c6_i32 : i32 to index
    %c0_75 = arith.constant 0 : index
    %c0_76 = arith.constant 0 : index
    %138 = vector.load %arg15[%137, %c0_75, %c0_76] : memref<8x8x128xf32, #tpu.memory_space<vmem>>, vector<1x8x128xf32>
    %139 = vector.shape_cast %138 : vector<1x8x128xf32> to vector<8x128xf32>
    %140 = arith.addf %139, %136 : vector<8x128xf32>
    %141 = math.tanh %140 : vector<8x128xf32>
    %142 = arith.index_cast %c6_i32 : i32 to index
    %c0_77 = arith.constant 0 : index
    %c0_78 = arith.constant 0 : index
    %143 = vector.load %arg12[%142, %c0_77, %c0_78] : memref<8x8x128xf32, #tpu.memory_space<vmem>>, vector<1x8x128xf32>
    %144 = vector.shape_cast %143 : vector<1x8x128xf32> to vector<8x128xf32>
    %145 = vector.shape_cast %141 : vector<8x128xf32> to vector<1x8x128xf32>
    tpu.vector_store %arg12[%142, %c0_77, %c0_78], %145 {strides = array<i32>} : memref<8x8x128xf32, #tpu.memory_space<vmem>>, vector<1x8x128xf32>,
    %c8_i32_79 = arith.constant 8 : i32
    %146 = arith.cmpi slt, %132, %c8_i32_79 : i32
    %147 = arith.select %146, %130, %129 : vector<8x128xf32>
    %148 = arith.select %146, %141, %130 : vector<8x128xf32>
    %c7_i32 = arith.constant 7 : i32
    %c8_i32_80 = arith.constant 8 : i32
    %149 = arith.muli %arg1, %c8_i32_80 : i32
    %150 = arith.addi %149, %c7_i32 : i32
    %cst_81 = arith.constant dense<0.000000e+00> : vector<8x128xf32>
    %151 = tpu.matmul %147, %12, %cst_81 {dimension_numbers = #tpu.dot_dimension_numbers<[1], [0], [0], [1], [0, 0, 1, 1], [], []>} : vector<8x128xf32>, vector<128x128xf32>, vector<8x128xf32> -> vector<8x128xf32>
    %152 = arith.addf %151, %15 : vector<8x128xf32>
    %c0_i32_82 = arith.constant 0 : i32
    %153 = arith.cmpi eq, %150, %c0_i32_82 : i32
    %154 = arith.select %153, %18, %152 : vector<8x128xf32>
    %155 = arith.index_cast %c7_i32 : i32 to index
    %c0_83 = arith.constant 0 : index
    %c0_84 = arith.constant 0 : index
    %156 = vector.load %arg15[%155, %c0_83, %c0_84] : memref<8x8x128xf32, #tpu.memory_space<vmem>>, vector<1x8x128xf32>
    %157 = vector.shape_cast %156 : vector<1x8x128xf32> to vector<8x128xf32>
    %158 = arith.addf %157, %154 : vector<8x128xf32>
    %159 = math.tanh %158 : vector<8x128xf32>
    %160 = arith.index_cast %c7_i32 : i32 to index
    %c0_85 = arith.constant 0 : index
    %c0_86 = arith.constant 0 : index
    %161 = vector.load %arg12[%160, %c0_85, %c0_86] : memref<8x8x128xf32, #tpu.memory_space<vmem>>, vector<1x8x128xf32>
    %162 = vector.shape_cast %161 : vector<1x8x128xf32> to vector<8x128xf32>
    %163 = vector.shape_cast %159 : vector<8x128xf32> to vector<1x8x128xf32>
    tpu.vector_store %arg12[%160, %c0_85, %c0_86], %163 {strides = array<i32>} : memref<8x8x128xf32, #tpu.memory_space<vmem>>, vector<1x8x128xf32>,
    %c8_i32_87 = arith.constant 8 : i32
    %164 = arith.cmpi slt, %150, %c8_i32_87 : i32
    %165 = arith.select %164, %148, %147 : vector<8x128xf32>
    %166 = arith.select %164, %159, %148 : vector<8x128xf32>
    %c8_i32_88 = arith.constant 8 : i32
    %c0_89 = arith.constant 0 : index
    %c0_90 = arith.constant 0 : index
    %c0_91 = arith.constant 0 : index
    %167 = vector.load %arg16[%c0_89, %c0_90, %c0_91] : memref<2x8x128xf32, #tpu.memory_space<vmem>>, vector<1x8x128xf32>
    %168 = vector.shape_cast %167 : vector<1x8x128xf32> to vector<8x128xf32>
    %169 = vector.shape_cast %165 : vector<8x128xf32> to vector<1x8x128xf32>
    tpu.vector_store %arg16[%c0_89, %c0_90, %c0_91], %169 {strides = array<i32>} : memref<2x8x128xf32, #tpu.memory_space<vmem>>, vector<1x8x128xf32>,
    %c1_92 = arith.constant 1 : index
    %c0_93 = arith.constant 0 : index
    %c0_94 = arith.constant 0 : index
    %170 = vector.load %arg16[%c1_92, %c0_93, %c0_94] : memref<2x8x128xf32, #tpu.memory_space<vmem>>, vector<1x8x128xf32>
    %171 = vector.shape_cast %170 : vector<1x8x128xf32> to vector<8x128xf32>
    %172 = vector.shape_cast %166 : vector<8x128xf32> to vector<1x8x128xf32>
    tpu.vector_store %arg16[%c1_92, %c0_93, %c0_94], %172 {strides = array<i32>} : memref<2x8x128xf32, #tpu.memory_space<vmem>>, vector<1x8x128xf32>,
    %c0_i32_95 = arith.constant 0 : i32
    %173 = arith.cmpi eq, %arg1, %c0_i32_95 : i32
    %174 = arith.extui %173 : i1 to i32
    %c0_i32_96 = arith.constant 0 : i32
    %175 = arith.cmpi ne, %174, %c0_i32_96 : i32
    scf.if %175 {
      %c0_97 = arith.constant 0 : index
      %c0_98 = arith.constant 0 : index
      %176 = vector.load %arg13[%c0_97, %c0_98] : memref<8x128xf32, #tpu.memory_space<vmem>>, vector<8x128xf32>
      tpu.vector_store %arg13[%c0_97, %c0_98], %166 {strides = array<i32>} : memref<8x128xf32, #tpu.memory_space<vmem>>, vector<8x128xf32>,
      %c0_99 = arith.constant 0 : index
      %c0_100 = arith.constant 0 : index
      %177 = vector.load %arg10[%c0_99, %c0_100] : memref<128x128xf32, #tpu.memory_space<vmem>>, vector<128x128xf32>
      %cst_101 = arith.constant dense<0.000000e+00> : vector<8x128xf32>
      %178 = tpu.matmul %165, %177, %cst_101 {dimension_numbers = #tpu.dot_dimension_numbers<[1], [0], [0], [1], [0, 0, 1, 1], [], []>} : vector<8x128xf32>, vector<128x128xf32>, vector<8x128xf32> -> vector<8x128xf32>
      %c0_102 = arith.constant 0 : index
      %c0_103 = arith.constant 0 : index
      %179 = vector.load %arg11[%c0_102, %c0_103] : memref<1x128xf32, #tpu.memory_space<vmem>>, vector<1x128xf32>
      %180 = vector.broadcast %179 : vector<1x128xf32> to vector<8x128xf32>
      %181 = arith.addf %178, %180 : vector<8x128xf32>
      %c0_104 = arith.constant 0 : index
      %c0_105 = arith.constant 0 : index
      %182 = vector.load %arg14[%c0_104, %c0_105] : memref<8x128xf32, #tpu.memory_space<vmem>>, vector<8x128xf32>
      tpu.vector_store %arg14[%c0_104, %c0_105], %181 {strides = array<i32>} : memref<8x128xf32, #tpu.memory_space<vmem>>, vector<8x128xf32>,
    } else {
    }
    return
  }
  func.func @transform_0(%arg0: i32, %arg1: i32) -> (i32, i32, i32) {
    %c0_i32 = arith.constant 0 : i32
    %c0_i32_0 = arith.constant 0 : i32
    return %arg1, %arg0, %c0_i32 : i32, i32, i32
  }
  func.func @transform_1(%arg0: i32, %arg1: i32) -> (i32, i32) {
    %c0_i32 = arith.constant 0 : i32
    %c0_i32_0 = arith.constant 0 : i32
    return %arg0, %c0_i32 : i32, i32
  }
  func.func @transform_2(%arg0: i32, %arg1: i32) -> (i32, i32) {
    %c0_i32 = arith.constant 0 : i32
    %c0_i32_0 = arith.constant 0 : i32
    return %arg0, %c0_i32 : i32, i32
  }
  func.func @transform_3(%arg0: i32, %arg1: i32) -> (i32, i32) {
    %c0_i32 = arith.constant 0 : i32
    %c0_i32_0 = arith.constant 0 : i32
    %c0_i32_1 = arith.constant 0 : i32
    return %c0_i32, %c0_i32_0 : i32, i32
  }
  func.func @transform_4(%arg0: i32, %arg1: i32) -> (i32, i32) {
    %c0_i32 = arith.constant 0 : i32
    %c0_i32_0 = arith.constant 0 : i32
    %c0_i32_1 = arith.constant 0 : i32
    return %c0_i32, %c0_i32_0 : i32, i32
  }
  func.func @transform_5(%arg0: i32, %arg1: i32) -> (i32, i32) {
    %c0_i32 = arith.constant 0 : i32
    %c0_i32_0 = arith.constant 0 : i32
    %c0_i32_1 = arith.constant 0 : i32
    return %c0_i32, %c0_i32_0 : i32, i32
  }
  func.func @transform_6(%arg0: i32, %arg1: i32) -> (i32, i32) {
    %c0_i32 = arith.constant 0 : i32
    %c0_i32_0 = arith.constant 0 : i32
    %c0_i32_1 = arith.constant 0 : i32
    return %c0_i32, %c0_i32_0 : i32, i32
  }
  func.func @transform_7(%arg0: i32, %arg1: i32) -> (i32, i32) {
    %c0_i32 = arith.constant 0 : i32
    %c0_i32_0 = arith.constant 0 : i32
    %c0_i32_1 = arith.constant 0 : i32
    return %c0_i32, %c0_i32_0 : i32, i32
  }
  func.func @transform_8(%arg0: i32, %arg1: i32) -> (i32, i32) {
    %c0_i32 = arith.constant 0 : i32
    %c0_i32_0 = arith.constant 0 : i32
    %c0_i32_1 = arith.constant 0 : i32
    return %c0_i32, %c0_i32_0 : i32, i32
  }
  func.func @transform_9(%arg0: i32, %arg1: i32) -> (i32, i32) {
    %c0_i32 = arith.constant 0 : i32
    %c0_i32_0 = arith.constant 0 : i32
    %c0_i32_1 = arith.constant 0 : i32
    return %c0_i32, %c0_i32_0 : i32, i32
  }
  func.func @transform_10(%arg0: i32, %arg1: i32) -> (i32, i32, i32) {
    %c0_i32 = arith.constant 0 : i32
    %c0_i32_0 = arith.constant 0 : i32
    return %arg1, %arg0, %c0_i32 : i32, i32, i32
  }
  func.func @transform_11(%arg0: i32, %arg1: i32) -> (i32, i32) {
    %c0_i32 = arith.constant 0 : i32
    %c0_i32_0 = arith.constant 0 : i32
    return %arg0, %c0_i32 : i32, i32
  }
  func.func @transform_12(%arg0: i32, %arg1: i32) -> (i32, i32) {
    %c0_i32 = arith.constant 0 : i32
    %c0_i32_0 = arith.constant 0 : i32
    return %arg0, %c0_i32 : i32, i32
  }
}

module attributes {stable_mosaic.version = 11 : i64} {
  func.func @_rnn_kernel(%arg0: i32, %arg1: i32, %arg2: memref<8x8x8xf32, #tpu.memory_space<vmem>>, %arg3: memref<8x128xf32, #tpu.memory_space<vmem>>, %arg4: memref<8x128xf32, #tpu.memory_space<vmem>>, %arg5: memref<8x128xf32, #tpu.memory_space<vmem>>, %arg6: memref<1x128xf32, #tpu.memory_space<vmem>>, %arg7: memref<128x128xf32, #tpu.memory_space<vmem>>, %arg8: memref<1x128xf32, #tpu.memory_space<vmem>>, %arg9: memref<128x128xf32, #tpu.memory_space<vmem>>, %arg10: memref<128x128xf32, #tpu.memory_space<vmem>>, %arg11: memref<1x128xf32, #tpu.memory_space<vmem>>, %arg12: memref<8x8x128xf32, #tpu.memory_space<vmem>>, %arg13: memref<8x128xf32, #tpu.memory_space<vmem>>, %arg14: memref<8x128xf32, #tpu.memory_space<vmem>>, %arg15: memref<8x8x128xf32, #tpu.memory_space<vmem>>, %arg16: memref<2x8x128xf32, #tpu.memory_space<vmem>>) attributes {dimension_semantics = [#tpu.dimension_semantics<parallel>, #tpu.dimension_semantics<arbitrary>], iteration_bounds = array<i64: 1, 1>, scalar_prefetch = 0 : i64, scratch_operands = 2 : i64, tpu.core_type = #tpu.core_type<tc>, window_params = [{transform_indices = @transform_0, window_bounds = array<i64: 8, 8, 8>}, {transform_indices = @transform_1, window_bounds = array<i64: 8, 128>}, {transform_indices = @transform_2, window_bounds = array<i64: 8, 128>}, {pipeline_mode = #tpu.pipeline_mode<synchronous>, transform_indices = @transform_3, window_bounds = array<i64: 8, 128>}, {pipeline_mode = #tpu.pipeline_mode<synchronous>, transform_indices = @transform_4, window_bounds = array<i64: 1, 128>}, {pipeline_mode = #tpu.pipeline_mode<synchronous>, transform_indices = @transform_5, window_bounds = array<i64: 128, 128>}, {pipeline_mode = #tpu.pipeline_mode<synchronous>, transform_indices = @transform_6, window_bounds = array<i64: 1, 128>}, {pipeline_mode = #tpu.pipeline_mode<synchronous>, transform_indices = @transform_7, window_bounds = array<i64: 128, 128>}, {pipeline_mode = #tpu.pipeline_mode<synchronous>, transform_indices = @transform_8, window_bounds = array<i64: 128, 128>}, {pipeline_mode = #tpu.pipeline_mode<synchronous>, transform_indices = @transform_9, window_bounds = array<i64: 1, 128>}, {transform_indices = @transform_10, window_bounds = array<i64: 8, 8, 128>}, {transform_indices = @transform_11, window_bounds = array<i64: 8, 128>}, {transform_indices = @transform_12, window_bounds = array<i64: 8, 128>}]} {
    %c0_i32 = arith.constant 0 : i32
    %0 = arith.cmpi eq, %arg1, %c0_i32 : i32
    %1 = arith.extui %0 : i1 to i32
    %c0_i32_0 = arith.constant 0 : i32
    %2 = arith.cmpi ne, %1, %c0_i32_0 : i32
    scf.if %2 {
      %c0_97 = arith.constant 0 : index
      %c0_98 = arith.constant 0 : index
      %176 = vector.load %arg3[%c0_97, %c0_98] : memref<8x128xf32, #tpu.memory_space<vmem>>, vector<8x128xf32>
      %c0_99 = arith.constant 0 : index
      %c0_100 = arith.constant 0 : index
      %c0_101 = arith.constant 0 : index
      %177 = vector.load %arg16[%c0_99, %c0_100, %c0_101] : memref<2x8x128xf32, #tpu.memory_space<vmem>>, vector<1x8x128xf32>
      %178 = vector.shape_cast %177 : vector<1x8x128xf32> to vector<8x128xf32>
      %179 = vector.shape_cast %176 : vector<8x128xf32> to vector<1x8x128xf32>
      tpu.vector_store %arg16[%c0_99, %c0_100, %c0_101], %179 {strides = array<i32>} : memref<2x8x128xf32, #tpu.memory_space<vmem>>, vector<1x8x128xf32>,
      %c1_102 = arith.constant 1 : index
      %c0_103 = arith.constant 0 : index
      %c0_104 = arith.constant 0 : index
      %180 = vector.load %arg16[%c1_102, %c0_103, %c0_104] : memref<2x8x128xf32, #tpu.memory_space<vmem>>, vector<1x8x128xf32>
      %181 = vector.shape_cast %180 : vector<1x8x128xf32> to vector<8x128xf32>
      %182 = vector.shape_cast %176 : vector<8x128xf32> to vector<1x8x128xf32>
      tpu.vector_store %arg16[%c1_102, %c0_103, %c0_104], %182 {strides = array<i32>} : memref<2x8x128xf32, #tpu.memory_space<vmem>>, vector<1x8x128xf32>,
    } else {
    }
    %c0 = arith.constant 0 : index
    %c0_1 = arith.constant 0 : index
    %c0_2 = arith.constant 0 : index
    %3 = vector.load %arg2[%c0, %c0_1, %c0_2] : memref<8x8x8xf32, #tpu.memory_space<vmem>>, vector<8x8x8xf32>
    %4 = vector.shape_cast %3 : vector<8x8x8xf32> to vector<64x8xf32>
    %c0_3 = arith.constant 0 : index
    %c0_4 = arith.constant 0 : index
    %5 = vector.load %arg5[%c0_3, %c0_4] : memref<8x128xf32, #tpu.memory_space<vmem>>, vector<8x128xf32>
    %cst = arith.constant dense<0.000000e+00> : vector<64x128xf32>
    %6 = tpu.matmul %4, %5, %cst {dimension_numbers = #tpu.dot_dimension_numbers<[1], [0], [0], [1], [0, 0, 1, 1], [], []>} : vector<64x8xf32>, vector<8x128xf32>, vector<64x128xf32> -> vector<64x128xf32>
    %c0_5 = arith.constant 0 : index
    %c0_6 = arith.constant 0 : index
    %7 = vector.load %arg6[%c0_5, %c0_6] : memref<1x128xf32, #tpu.memory_space<vmem>>, vector<1x128xf32>
    %8 = vector.broadcast %7 : vector<1x128xf32> to vector<64x128xf32>
    %9 = arith.addf %6, %8 : vector<64x128xf32>
    %10 = vector.shape_cast %9 : vector<64x128xf32> to vector<8x8x128xf32>
    %c0_7 = arith.constant 0 : index
    %c0_8 = arith.constant 0 : index
    %c0_9 = arith.constant 0 : index
    %11 = vector.load %arg15[%c0_7, %c0_8, %c0_9] : memref<8x8x128xf32, #tpu.memory_space<vmem>>, vector<8x8x128xf32>
    tpu.vector_store %arg15[%c0_7, %c0_8, %c0_9], %10 {strides = array<i32>} : memref<8x8x128xf32, #tpu.memory_space<vmem>>, vector<8x8x128xf32>,
    %c0_10 = arith.constant 0 : index
    %c0_11 = arith.constant 0 : index
    %12 = vector.load %arg7[%c0_10, %c0_11] : memref<128x128xf32, #tpu.memory_space<vmem>>, vector<128x128xf32>
    %c0_12 = arith.constant 0 : index
    %c0_13 = arith.constant 0 : index
    %13 = vector.load %arg8[%c0_12, %c0_13] : memref<1x128xf32, #tpu.memory_space<vmem>>, vector<1x128xf32>
    %14 = vector.shape_cast %13 : vector<1x128xf32> to vector<1x128xf32>
    %15 = vector.broadcast %14 : vector<1x128xf32> to vector<8x128xf32>
    %c0_14 = arith.constant 0 : index
    %c0_15 = arith.constant 0 : index
    %16 = vector.load %arg4[%c0_14, %c0_15] : memref<8x128xf32, #tpu.memory_space<vmem>>, vector<8x128xf32>
    %c0_16 = arith.constant 0 : index
    %c0_17 = arith.constant 0 : index
    %17 = vector.load %arg9[%c0_16, %c0_17] : memref<128x128xf32, #tpu.memory_space<vmem>>, vector<128x128xf32>
    %cst_18 = arith.constant dense<0.000000e+00> : vector<8x128xf32>
    %18 = tpu.matmul %16, %17, %cst_18 {dimension_numbers = #tpu.dot_dimension_numbers<[1], [0], [0], [1], [0, 0, 1, 1], [], []>} : vector<8x128xf32>, vector<128x128xf32>, vector<8x128xf32> -> vector<8x128xf32>
    %c0_19 = arith.constant 0 : index
    %c0_20 = arith.constant 0 : index
    %c0_21 = arith.constant 0 : index
    %19 = vector.load %arg16[%c0_19, %c0_20, %c0_21] : memref<2x8x128xf32, #tpu.memory_space<vmem>>, vector<1x8x128xf32>
    %20 = vector.shape_cast %19 : vector<1x8x128xf32> to vector<8x128xf32>
    %c1 = arith.constant 1 : index
    %c0_22 = arith.constant 0 : index
    %c0_23 = arith.constant 0 : index
    %21 = vector.load %arg16[%c1, %c0_22, %c0_23] : memref<2x8x128xf32, #tpu.memory_space<vmem>>, vector<1x8x128xf32>
    %22 = vector.shape_cast %21 : vector<1x8x128xf32> to vector<8x128xf32>
    %c0_i32_24 = arith.constant 0 : i32
    %c8_i32 = arith.constant 8 : i32
    %23 = arith.muli %arg1, %c8_i32 : i32
    %24 = arith.addi %23, %c0_i32_24 : i32
    %cst_25 = arith.constant dense<0.000000e+00> : vector<8x128xf32>
    %25 = tpu.matmul %20, %12, %cst_25 {dimension_numbers = #tpu.dot_dimension_numbers<[1], [0], [0], [1], [0, 0, 1, 1], [], []>} : vector<8x128xf32>, vector<128x128xf32>, vector<8x128xf32> -> vector<8x128xf32>
    %26 = arith.addf %25, %15 : vector<8x128xf32>
    %c0_i32_26 = arith.constant 0 : i32
    %27 = arith.cmpi eq, %24, %c0_i32_26 : i32
    %28 = arith.select %27, %18, %26 : vector<8x128xf32>
    %29 = arith.index_cast %c0_i32_24 : i32 to index
    %c0_27 = arith.constant 0 : index
    %c0_28 = arith.constant 0 : index
    %30 = vector.load %arg15[%29, %c0_27, %c0_28] : memref<8x8x128xf32, #tpu.memory_space<vmem>>, vector<1x8x128xf32>
    %31 = vector.shape_cast %30 : vector<1x8x128xf32> to vector<8x128xf32>
    %32 = arith.addf %31, %28 : vector<8x128xf32>
    %33 = math.tanh %32 : vector<8x128xf32>
    %34 = arith.index_cast %c0_i32_24 : i32 to index
    %c0_29 = arith.constant 0 : index
    %c0_30 = arith.constant 0 : index
    %35 = vector.load %arg12[%34, %c0_29, %c0_30] : memref<8x8x128xf32, #tpu.memory_space<vmem>>, vector<1x8x128xf32>
    %36 = vector.shape_cast %35 : vector<1x8x128xf32> to vector<8x128xf32>
    %37 = vector.shape_cast %33 : vector<8x128xf32> to vector<1x8x128xf32>
    tpu.vector_store %arg12[%34, %c0_29, %c0_30], %37 {strides = array<i32>} : memref<8x8x128xf32, #tpu.memory_space<vmem>>, vector<1x8x128xf32>,
    %c8_i32_31 = arith.constant 8 : i32
    %38 = arith.cmpi slt, %24, %c8_i32_31 : i32
    %39 = arith.select %38, %22, %20 : vector<8x128xf32>
    %40 = arith.select %38, %33, %22 : vector<8x128xf32>
    %c1_i32 = arith.constant 1 : i32
    %c8_i32_32 = arith.constant 8 : i32
    %41 = arith.muli %arg1, %c8_i32_32 : i32
    %42 = arith.addi %41, %c1_i32 : i32
    %cst_33 = arith.constant dense<0.000000e+00> : vector<8x128xf32>
    %43 = tpu.matmul %39, %12, %cst_33 {dimension_numbers = #tpu.dot_dimension_numbers<[1], [0], [0], [1], [0, 0, 1, 1], [], []>} : vector<8x128xf32>, vector<128x128xf32>, vector<8x128xf32> -> vector<8x128xf32>
    %44 = arith.addf %43, %15 : vector<8x128xf32>
    %c0_i32_34 = arith.constant 0 : i32
    %45 = arith.cmpi eq, %42, %c0_i32_34 : i32
    %46 = arith.select %45, %18, %44 : vector<8x128xf32>
    %47 = arith.index_cast %c1_i32 : i32 to index
    %c0_35 = arith.constant 0 : index
    %c0_36 = arith.constant 0 : index
    %48 = vector.load %arg15[%47, %c0_35, %c0_36] : memref<8x8x128xf32, #tpu.memory_space<vmem>>, vector<1x8x128xf32>
    %49 = vector.shape_cast %48 : vector<1x8x128xf32> to vector<8x128xf32>
    %50 = arith.addf %49, %46 : vector<8x128xf32>
    %51 = math.tanh %50 : vector<8x128xf32>
    %52 = arith.index_cast %c1_i32 : i32 to index
    %c0_37 = arith.constant 0 : index
    %c0_38 = arith.constant 0 : index
    %53 = vector.load %arg12[%52, %c0_37, %c0_38] : memref<8x8x128xf32, #tpu.memory_space<vmem>>, vector<1x8x128xf32>
    %54 = vector.shape_cast %53 : vector<1x8x128xf32> to vector<8x128xf32>
    %55 = vector.shape_cast %51 : vector<8x128xf32> to vector<1x8x128xf32>
    tpu.vector_store %arg12[%52, %c0_37, %c0_38], %55 {strides = array<i32>} : memref<8x8x128xf32, #tpu.memory_space<vmem>>, vector<1x8x128xf32>,
    %c8_i32_39 = arith.constant 8 : i32
    %56 = arith.cmpi slt, %42, %c8_i32_39 : i32
    %57 = arith.select %56, %40, %39 : vector<8x128xf32>
    %58 = arith.select %56, %51, %40 : vector<8x128xf32>
    %c2_i32 = arith.constant 2 : i32
    %c8_i32_40 = arith.constant 8 : i32
    %59 = arith.muli %arg1, %c8_i32_40 : i32
    %60 = arith.addi %59, %c2_i32 : i32
    %cst_41 = arith.constant dense<0.000000e+00> : vector<8x128xf32>
    %61 = tpu.matmul %57, %12, %cst_41 {dimension_numbers = #tpu.dot_dimension_numbers<[1], [0], [0], [1], [0, 0, 1, 1], [], []>} : vector<8x128xf32>, vector<128x128xf32>, vector<8x128xf32> -> vector<8x128xf32>
    %62 = arith.addf %61, %15 : vector<8x128xf32>
    %c0_i32_42 = arith.constant 0 : i32
    %63 = arith.cmpi eq, %60, %c0_i32_42 : i32
    %64 = arith.select %63, %18, %62 : vector<8x128xf32>
    %65 = arith.index_cast %c2_i32 : i32 to index
    %c0_43 = arith.constant 0 : index
    %c0_44 = arith.constant 0 : index
    %66 = vector.load %arg15[%65, %c0_43, %c0_44] : memref<8x8x128xf32, #tpu.memory_space<vmem>>, vector<1x8x128xf32>
    %67 = vector.shape_cast %66 : vector<1x8x128xf32> to vector<8x128xf32>
    %68 = arith.addf %67, %64 : vector<8x128xf32>
    %69 = math.tanh %68 : vector<8x128xf32>
    %70 = arith.index_cast %c2_i32 : i32 to index
    %c0_45 = arith.constant 0 : index
    %c0_46 = arith.constant 0 : index
    %71 = vector.load %arg12[%70, %c0_45, %c0_46] : memref<8x8x128xf32, #tpu.memory_space<vmem>>, vector<1x8x128xf32>
    %72 = vector.shape_cast %71 : vector<1x8x128xf32> to vector<8x128xf32>
    %73 = vector.shape_cast %69 : vector<8x128xf32> to vector<1x8x128xf32>
    tpu.vector_store %arg12[%70, %c0_45, %c0_46], %73 {strides = array<i32>} : memref<8x8x128xf32, #tpu.memory_space<vmem>>, vector<1x8x128xf32>,
    %c8_i32_47 = arith.constant 8 : i32
    %74 = arith.cmpi slt, %60, %c8_i32_47 : i32
    %75 = arith.select %74, %58, %57 : vector<8x128xf32>
    %76 = arith.select %74, %69, %58 : vector<8x128xf32>
    %c3_i32 = arith.constant 3 : i32
    %c8_i32_48 = arith.constant 8 : i32
    %77 = arith.muli %arg1, %c8_i32_48 : i32
    %78 = arith.addi %77, %c3_i32 : i32
    %cst_49 = arith.constant dense<0.000000e+00> : vector<8x128xf32>
    %79 = tpu.matmul %75, %12, %cst_49 {dimension_numbers = #tpu.dot_dimension_numbers<[1], [0], [0], [1], [0, 0, 1, 1], [], []>} : vector<8x128xf32>, vector<128x128xf32>, vector<8x128xf32> -> vector<8x128xf32>
    %80 = arith.addf %79, %15 : vector<8x128xf32>
    %c0_i32_50 = arith.constant 0 : i32
    %81 = arith.cmpi eq, %78, %c0_i32_50 : i32
    %82 = arith.select %81, %18, %80 : vector<8x128xf32>
    %83 = arith.index_cast %c3_i32 : i32 to index
    %c0_51 = arith.constant 0 : index
    %c0_52 = arith.constant 0 : index
    %84 = vector.load %arg15[%83, %c0_51, %c0_52] : memref<8x8x128xf32, #tpu.memory_space<vmem>>, vector<1x8x128xf32>
    %85 = vector.shape_cast %84 : vector<1x8x128xf32> to vector<8x128xf32>
    %86 = arith.addf %85, %82 : vector<8x128xf32>
    %87 = math.tanh %86 : vector<8x128xf32>
    %88 = arith.index_cast %c3_i32 : i32 to index
    %c0_53 = arith.constant 0 : index
    %c0_54 = arith.constant 0 : index
    %89 = vector.load %arg12[%88, %c0_53, %c0_54] : memref<8x8x128xf32, #tpu.memory_space<vmem>>, vector<1x8x128xf32>
    %90 = vector.shape_cast %89 : vector<1x8x128xf32> to vector<8x128xf32>
    %91 = vector.shape_cast %87 : vector<8x128xf32> to vector<1x8x128xf32>
    tpu.vector_store %arg12[%88, %c0_53, %c0_54], %91 {strides = array<i32>} : memref<8x8x128xf32, #tpu.memory_space<vmem>>, vector<1x8x128xf32>,
    %c8_i32_55 = arith.constant 8 : i32
    %92 = arith.cmpi slt, %78, %c8_i32_55 : i32
    %93 = arith.select %92, %76, %75 : vector<8x128xf32>
    %94 = arith.select %92, %87, %76 : vector<8x128xf32>
    %c4_i32 = arith.constant 4 : i32
    %c8_i32_56 = arith.constant 8 : i32
    %95 = arith.muli %arg1, %c8_i32_56 : i32
    %96 = arith.addi %95, %c4_i32 : i32
    %cst_57 = arith.constant dense<0.000000e+00> : vector<8x128xf32>
    %97 = tpu.matmul %93, %12, %cst_57 {dimension_numbers = #tpu.dot_dimension_numbers<[1], [0], [0], [1], [0, 0, 1, 1], [], []>} : vector<8x128xf32>, vector<128x128xf32>, vector<8x128xf32> -> vector<8x128xf32>
    %98 = arith.addf %97, %15 : vector<8x128xf32>
    %c0_i32_58 = arith.constant 0 : i32
    %99 = arith.cmpi eq, %96, %c0_i32_58 : i32
    %100 = arith.select %99, %18, %98 : vector<8x128xf32>
    %101 = arith.index_cast %c4_i32 : i32 to index
    %c0_59 = arith.constant 0 : index
    %c0_60 = arith.constant 0 : index
    %102 = vector.load %arg15[%101, %c0_59, %c0_60] : memref<8x8x128xf32, #tpu.memory_space<vmem>>, vector<1x8x128xf32>
    %103 = vector.shape_cast %102 : vector<1x8x128xf32> to vector<8x128xf32>
    %104 = arith.addf %103, %100 : vector<8x128xf32>
    %105 = math.tanh %104 : vector<8x128xf32>
    %106 = arith.index_cast %c4_i32 : i32 to index
    %c0_61 = arith.constant 0 : index
    %c0_62 = arith.constant 0 : index
    %107 = vector.load %arg12[%106, %c0_61, %c0_62] : memref<8x8x128xf32, #tpu.memory_space<vmem>>, vector<1x8x128xf32>
    %108 = vector.shape_cast %107 : vector<1x8x128xf32> to vector<8x128xf32>
    %109 = vector.shape_cast %105 : vector<8x128xf32> to vector<1x8x128xf32>
    tpu.vector_store %arg12[%106, %c0_61, %c0_62], %109 {strides = array<i32>} : memref<8x8x128xf32, #tpu.memory_space<vmem>>, vector<1x8x128xf32>,
    %c8_i32_63 = arith.constant 8 : i32
    %110 = arith.cmpi slt, %96, %c8_i32_63 : i32
    %111 = arith.select %110, %94, %93 : vector<8x128xf32>
    %112 = arith.select %110, %105, %94 : vector<8x128xf32>
    %c5_i32 = arith.constant 5 : i32
    %c8_i32_64 = arith.constant 8 : i32
    %113 = arith.muli %arg1, %c8_i32_64 : i32
    %114 = arith.addi %113, %c5_i32 : i32
    %cst_65 = arith.constant dense<0.000000e+00> : vector<8x128xf32>
    %115 = tpu.matmul %111, %12, %cst_65 {dimension_numbers = #tpu.dot_dimension_numbers<[1], [0], [0], [1], [0, 0, 1, 1], [], []>} : vector<8x128xf32>, vector<128x128xf32>, vector<8x128xf32> -> vector<8x128xf32>
    %116 = arith.addf %115, %15 : vector<8x128xf32>
    %c0_i32_66 = arith.constant 0 : i32
    %117 = arith.cmpi eq, %114, %c0_i32_66 : i32
    %118 = arith.select %117, %18, %116 : vector<8x128xf32>
    %119 = arith.index_cast %c5_i32 : i32 to index
    %c0_67 = arith.constant 0 : index
    %c0_68 = arith.constant 0 : index
    %120 = vector.load %arg15[%119, %c0_67, %c0_68] : memref<8x8x128xf32, #tpu.memory_space<vmem>>, vector<1x8x128xf32>
    %121 = vector.shape_cast %120 : vector<1x8x128xf32> to vector<8x128xf32>
    %122 = arith.addf %121, %118 : vector<8x128xf32>
    %123 = math.tanh %122 : vector<8x128xf32>
    %124 = arith.index_cast %c5_i32 : i32 to index
    %c0_69 = arith.constant 0 : index
    %c0_70 = arith.constant 0 : index
    %125 = vector.load %arg12[%124, %c0_69, %c0_70] : memref<8x8x128xf32, #tpu.memory_space<vmem>>, vector<1x8x128xf32>
    %126 = vector.shape_cast %125 : vector<1x8x128xf32> to vector<8x128xf32>
    %127 = vector.shape_cast %123 : vector<8x128xf32> to vector<1x8x128xf32>
    tpu.vector_store %arg12[%124, %c0_69, %c0_70], %127 {strides = array<i32>} : memref<8x8x128xf32, #tpu.memory_space<vmem>>, vector<1x8x128xf32>,
    %c8_i32_71 = arith.constant 8 : i32
    %128 = arith.cmpi slt, %114, %c8_i32_71 : i32
    %129 = arith.select %128, %112, %111 : vector<8x128xf32>
    %130 = arith.select %128, %123, %112 : vector<8x128xf32>
    %c6_i32 = arith.constant 6 : i32
    %c8_i32_72 = arith.constant 8 : i32
    %131 = arith.muli %arg1, %c8_i32_72 : i32
    %132 = arith.addi %131, %c6_i32 : i32
    %cst_73 = arith.constant dense<0.000000e+00> : vector<8x128xf32>
    %133 = tpu.matmul %129, %12, %cst_73 {dimension_numbers = #tpu.dot_dimension_numbers<[1], [0], [0], [1], [0, 0, 1, 1], [], []>} : vector<8x128xf32>, vector<128x128xf32>, vector<8x128xf32> -> vector<8x128xf32>
    %134 = arith.addf %133, %15 : vector<8x128xf32>
    %c0_i32_74 = arith.constant 0 : i32
    %135 = arith.cmpi eq, %132, %c0_i32_74 : i32
    %136 = arith.select %135, %18, %134 : vector<8x128xf32>
    %137 = arith.index_cast %c6_i32 : i32 to index
    %c0_75 = arith.constant 0 : index
    %c0_76 = arith.constant 0 : index
    %138 = vector.load %arg15[%137, %c0_75, %c0_76] : memref<8x8x128xf32, #tpu.memory_space<vmem>>, vector<1x8x128xf32>
    %139 = vector.shape_cast %138 : vector<1x8x128xf32> to vector<8x128xf32>
    %140 = arith.addf %139, %136 : vector<8x128xf32>
    %141 = math.tanh %140 : vector<8x128xf32>
    %142 = arith.index_cast %c6_i32 : i32 to index
    %c0_77 = arith.constant 0 : index
    %c0_78 = arith.constant 0 : index
    %143 = vector.load %arg12[%142, %c0_77, %c0_78] : memref<8x8x128xf32, #tpu.memory_space<vmem>>, vector<1x8x128xf32>
    %144 = vector.shape_cast %143 : vector<1x8x128xf32> to vector<8x128xf32>
    %145 = vector.shape_cast %141 : vector<8x128xf32> to vector<1x8x128xf32>
    tpu.vector_store %arg12[%142, %c0_77, %c0_78], %145 {strides = array<i32>} : memref<8x8x128xf32, #tpu.memory_space<vmem>>, vector<1x8x128xf32>,
    %c8_i32_79 = arith.constant 8 : i32
    %146 = arith.cmpi slt, %132, %c8_i32_79 : i32
    %147 = arith.select %146, %130, %129 : vector<8x128xf32>
    %148 = arith.select %146, %141, %130 : vector<8x128xf32>
    %c7_i32 = arith.constant 7 : i32
    %c8_i32_80 = arith.constant 8 : i32
    %149 = arith.muli %arg1, %c8_i32_80 : i32
    %150 = arith.addi %149, %c7_i32 : i32
    %cst_81 = arith.constant dense<0.000000e+00> : vector<8x128xf32>
    %151 = tpu.matmul %147, %12, %cst_81 {dimension_numbers = #tpu.dot_dimension_numbers<[1], [0], [0], [1], [0, 0, 1, 1], [], []>} : vector<8x128xf32>, vector<128x128xf32>, vector<8x128xf32> -> vector<8x128xf32>
    %152 = arith.addf %151, %15 : vector<8x128xf32>
    %c0_i32_82 = arith.constant 0 : i32
    %153 = arith.cmpi eq, %150, %c0_i32_82 : i32
    %154 = arith.select %153, %18, %152 : vector<8x128xf32>
    %155 = arith.index_cast %c7_i32 : i32 to index
    %c0_83 = arith.constant 0 : index
    %c0_84 = arith.constant 0 : index
    %156 = vector.load %arg15[%155, %c0_83, %c0_84] : memref<8x8x128xf32, #tpu.memory_space<vmem>>, vector<1x8x128xf32>
    %157 = vector.shape_cast %156 : vector<1x8x128xf32> to vector<8x128xf32>
    %158 = arith.addf %157, %154 : vector<8x128xf32>
    %159 = math.tanh %158 : vector<8x128xf32>
    %160 = arith.index_cast %c7_i32 : i32 to index
    %c0_85 = arith.constant 0 : index
    %c0_86 = arith.constant 0 : index
    %161 = vector.load %arg12[%160, %c0_85, %c0_86] : memref<8x8x128xf32, #tpu.memory_space<vmem>>, vector<1x8x128xf32>
    %162 = vector.shape_cast %161 : vector<1x8x128xf32> to vector<8x128xf32>
    %163 = vector.shape_cast %159 : vector<8x128xf32> to vector<1x8x128xf32>
    tpu.vector_store %arg12[%160, %c0_85, %c0_86], %163 {strides = array<i32>} : memref<8x8x128xf32, #tpu.memory_space<vmem>>, vector<1x8x128xf32>,
    %c8_i32_87 = arith.constant 8 : i32
    %164 = arith.cmpi slt, %150, %c8_i32_87 : i32
    %165 = arith.select %164, %148, %147 : vector<8x128xf32>
    %166 = arith.select %164, %159, %148 : vector<8x128xf32>
    %c8_i32_88 = arith.constant 8 : i32
    %c0_89 = arith.constant 0 : index
    %c0_90 = arith.constant 0 : index
    %c0_91 = arith.constant 0 : index
    %167 = vector.load %arg16[%c0_89, %c0_90, %c0_91] : memref<2x8x128xf32, #tpu.memory_space<vmem>>, vector<1x8x128xf32>
    %168 = vector.shape_cast %167 : vector<1x8x128xf32> to vector<8x128xf32>
    %169 = vector.shape_cast %165 : vector<8x128xf32> to vector<1x8x128xf32>
    tpu.vector_store %arg16[%c0_89, %c0_90, %c0_91], %169 {strides = array<i32>} : memref<2x8x128xf32, #tpu.memory_space<vmem>>, vector<1x8x128xf32>,
    %c1_92 = arith.constant 1 : index
    %c0_93 = arith.constant 0 : index
    %c0_94 = arith.constant 0 : index
    %170 = vector.load %arg16[%c1_92, %c0_93, %c0_94] : memref<2x8x128xf32, #tpu.memory_space<vmem>>, vector<1x8x128xf32>
    %171 = vector.shape_cast %170 : vector<1x8x128xf32> to vector<8x128xf32>
    %172 = vector.shape_cast %166 : vector<8x128xf32> to vector<1x8x128xf32>
    tpu.vector_store %arg16[%c1_92, %c0_93, %c0_94], %172 {strides = array<i32>} : memref<2x8x128xf32, #tpu.memory_space<vmem>>, vector<1x8x128xf32>,
    %c0_i32_95 = arith.constant 0 : i32
    %173 = arith.cmpi eq, %arg1, %c0_i32_95 : i32
    %174 = arith.extui %173 : i1 to i32
    %c0_i32_96 = arith.constant 0 : i32
    %175 = arith.cmpi ne, %174, %c0_i32_96 : i32
    scf.if %175 {
      %c0_97 = arith.constant 0 : index
      %c0_98 = arith.constant 0 : index
      %176 = vector.load %arg13[%c0_97, %c0_98] : memref<8x128xf32, #tpu.memory_space<vmem>>, vector<8x128xf32>
      tpu.vector_store %arg13[%c0_97, %c0_98], %166 {strides = array<i32>} : memref<8x128xf32, #tpu.memory_space<vmem>>, vector<8x128xf32>,
      %c0_99 = arith.constant 0 : index
      %c0_100 = arith.constant 0 : index
      %177 = vector.load %arg10[%c0_99, %c0_100] : memref<128x128xf32, #tpu.memory_space<vmem>>, vector<128x128xf32>
      %cst_101 = arith.constant dense<0.000000e+00> : vector<8x128xf32>
      %178 = tpu.matmul %165, %177, %cst_101 {dimension_numbers = #tpu.dot_dimension_numbers<[1], [0], [0], [1], [0, 0, 1, 1], [], []>} : vector<8x128xf32>, vector<128x128xf32>, vector<8x128xf32> -> vector<8x128xf32>
      %c0_102 = arith.constant 0 : index
      %c0_103 = arith.constant 0 : index
      %179 = vector.load %arg11[%c0_102, %c0_103] : memref<1x128xf32, #tpu.memory_space<vmem>>, vector<1x128xf32>
      %180 = vector.broadcast %179 : vector<1x128xf32> to vector<8x128xf32>
      %181 = arith.addf %178, %180 : vector<8x128xf32>
      %c0_104 = arith.constant 0 : index
      %c0_105 = arith.constant 0 : index
      %182 = vector.load %arg14[%c0_104, %c0_105] : memref<8x128xf32, #tpu.memory_space<vmem>>, vector<8x128xf32>
      tpu.vector_store %arg14[%c0_104, %c0_105], %181 {strides = array<i32>} : memref<8x128xf32, #tpu.memory_space<vmem>>, vector<8x128xf32>,
    } else {
    }
    return
  }
  func.func @transform_0(%arg0: i32, %arg1: i32) -> (i32, i32, i32) {
    %c0_i32 = arith.constant 0 : i32
    %c0_i32_0 = arith.constant 0 : i32
    return %arg1, %arg0, %c0_i32 : i32, i32, i32
  }
  func.func @transform_1(%arg0: i32, %arg1: i32) -> (i32, i32) {
    %c0_i32 = arith.constant 0 : i32
    %c0_i32_0 = arith.constant 0 : i32
    return %arg0, %c0_i32 : i32, i32
  }
  func.func @transform_2(%arg0: i32, %arg1: i32) -> (i32, i32) {
    %c0_i32 = arith.constant 0 : i32
    %c0_i32_0 = arith.constant 0 : i32
    return %arg0, %c0_i32 : i32, i32
  }
  func.func @transform_3(%arg0: i32, %arg1: i32) -> (i32, i32) {
    %c0_i32 = arith.constant 0 : i32
    %c0_i32_0 = arith.constant 0 : i32
    %c0_i32_1 = arith.constant 0 : i32
    return %c0_i32, %c0_i32_0 : i32, i32
  }
  func.func @transform_4(%arg0: i32, %arg1: i32) -> (i32, i32) {
    %c0_i32 = arith.constant 0 : i32
    %c0_i32_0 = arith.constant 0 : i32
    %c0_i32_1 = arith.constant 0 : i32
    return %c0_i32, %c0_i32_0 : i32, i32
  }
  func.func @transform_5(%arg0: i32, %arg1: i32) -> (i32, i32) {
    %c0_i32 = arith.constant 0 : i32
    %c0_i32_0 = arith.constant 0 : i32
    %c0_i32_1 = arith.constant 0 : i32
    return %c0_i32, %c0_i32_0 : i32, i32
  }
  func.func @transform_6(%arg0: i32, %arg1: i32) -> (i32, i32) {
    %c0_i32 = arith.constant 0 : i32
    %c0_i32_0 = arith.constant 0 : i32
    %c0_i32_1 = arith.constant 0 : i32
    return %c0_i32, %c0_i32_0 : i32, i32
  }
  func.func @transform_7(%arg0: i32, %arg1: i32) -> (i32, i32) {
    %c0_i32 = arith.constant 0 : i32
    %c0_i32_0 = arith.constant 0 : i32
    %c0_i32_1 = arith.constant 0 : i32
    return %c0_i32, %c0_i32_0 : i32, i32
  }
  func.func @transform_8(%arg0: i32, %arg1: i32) -> (i32, i32) {
    %c0_i32 = arith.constant 0 : i32
    %c0_i32_0 = arith.constant 0 : i32
    %c0_i32_1 = arith.constant 0 : i32
    return %c0_i32, %c0_i32_0 : i32, i32
  }
  func.func @transform_9(%arg0: i32, %arg1: i32) -> (i32, i32) {
    %c0_i32 = arith.constant 0 : i32
    %c0_i32_0 = arith.constant 0 : i32
    %c0_i32_1 = arith.constant 0 : i32
    return %c0_i32, %c0_i32_0 : i32, i32
  }
  func.func @transform_10(%arg0: i32, %arg1: i32) -> (i32, i32, i32) {
    %c0_i32 = arith.constant 0 : i32
    %c0_i32_0 = arith.constant 0 : i32
    return %arg1, %arg0, %c0_i32 : i32, i32, i32
  }
  func.func @transform_11(%arg0: i32, %arg1: i32) -> (i32, i32) {
    %c0_i32 = arith.constant 0 : i32
    %c0_i32_0 = arith.constant 0 : i32
    return %arg0, %c0_i32 : i32, i32
  }
  func.func @transform_12(%arg0: i32, %arg1: i32) -> (i32, i32) {
    %c0_i32 = arith.constant 0 : i32
    %c0_i32_0 = arith.constant 0 : i32
    return %arg0, %c0_i32 : i32, i32
  }
}

</mosaic_0001>

<bundles_post_ra>
// kernel: tpu_custom_call.1
= control target key start
LH: loop header
LB: loop body
LE: loop exit
PB: predicated region body
PF: predicated region fallthrough
CT: control target
= control target key end

     0   :  { %18 = vsyncpa [#allocation5], 0  ;;  %s1309_s0 = inlined_call_operand.hbm [shape: f32[8,8,8], index: 0, kind: input, shape index: {}]   ;;  %s1310_s1 = inlined_call_operand.hbm [shape: f32[8,128], index: 1, kind: input, shape index: {}]   ;;  %s1311_s2 = inlined_call_operand.hbm [shape: f32[8,128], index: 2, kind: input, shape index: {}]   ;;  %s1312_s3 = inlined_call_operand.hbm [shape: f32[8,128], index: 3, kind: input, shape index: {}]   ;;  %s1313_s4 = inlined_call_operand.vmem [shape: f32[1,128], index: 4, kind: input, shape index: {}]   ;;  %s1314_s5 = inlined_call_operand.hbm [shape: f32[128,128], index: 5, kind: input, shape index: {}]   ;;  %s1315_s6 = inlined_call_operand.vmem [shape: f32[1,128], index: 6, kind: input, shape index: {}]   ;;  %s1316_s7 = inlined_call_operand.hbm [shape: f32[128,128], index: 7, kind: input, shape index: {}]   ;;  %s1317_s8 = inlined_call_operand.hbm [shape: f32[128,128], index: 8, kind: input, shape index: {}]   ;;  %s1318_s9 = inlined_call_operand.vmem [shape: f32[1,128], index: 9, kind: input, shape index: {}]   ;;  %s1319_s10 = inlined_call_operand.hbm [shape: f32[8,8,128], index: 10, kind: output, shape index: {0}]   ;;  %s1320_s11 = inlined_call_operand.hbm [shape: f32[8,128], index: 11, kind: output, shape index: {1}]   ;;  %s1321_s12 = inlined_call_operand.hbm [shape: f32[8,128], index: 12, kind: output, shape index: {2}]  }
   0x1   :  { %19 = vsyncpa [#allocation8], 0 }
   0x2   :  { %20 = vsyncpa [#allocation11], 0 }
   0x3   :  { %21 = vsyncpa [#allocation14], 0 }
   0x4   :  { %22 = vsyncpa [#allocation6], 0  ;;  %s42_s23 = sshll.u32 %s1310_s1, 4  ;;  %s43_s23 = int_to_ptr.hbm [resolvable:$true] %s42_s23 }
   0x5   :  { %23 = vsyncpa [#allocation18], 0  ;;  %s991_s24 = smov [#allocation7]   ;;  %s64_s28 = sshll.u32 %s1312_s3, 4  ;;  %s65_s28 = int_to_ptr.hbm [resolvable:$true] %s64_s28 }
   0x6   :  { %s44_s25 = sshll.u32 %s991_s24, 4  ;;  %s992_s29 = smov [#allocation10]   ;;  %s45_s25 = int_to_ptr.vmem [resolvable:$true] %s44_s25 }
   0x7   :  { %47 = dma.hbm_to_vmem [thread:$0]  %s43_s23, 128, %s45_s25, [#allocation8]  }
   0x8   :  { %s66_s30 = sshll.u32 %s992_s29, 4  ;;  %s91_s15 = sshll.u32 %s1316_s7, 4  ;;  %s67_s30 = int_to_ptr.vmem [resolvable:$true] %s66_s30  ;;  %s92_s15 = int_to_ptr.hbm [resolvable:$true] %s91_s15 }
   0x9   :  { %69 = dma.hbm_to_vmem [thread:$0]  %s65_s28, 128, %s67_s30, [#allocation11]  }
   0xa   :  { %s993_s1 = smov [#allocation13]   ;;  %s28_s19 = sshll.u32 %s1309_s0, 4  ;;  %s29_s19 = int_to_ptr.hbm [resolvable:$true] %s28_s19 }
   0xb   :  { %s93_s16 = sshll.u32 %s993_s1, 4  ;;  %s994_s20 = smov 128   ;;  %s94_s16 = int_to_ptr.vmem [resolvable:$true] %s93_s16 }
   0xc   :  { %s995_s3 = smov 8   ;;  %s996_s21 = smov [#allocation4]  }
   0xd   :  { %99 = dma.hbm_to_vmem [thread:$0]  %s92_s15, 2048, %s94_s16, [#allocation14], %s994_s20, %s994_s20, %s995_s3  }
   0xe   :  { %s30_s22 = sshll.u32 %s996_s21, 4  ;;  %s53_s7 = sshll.u32 %s1311_s2, 4  ;;  %s31_s22 = int_to_ptr.vmem [resolvable:$true] %s30_s22  ;;  %s54_s7 = int_to_ptr.hbm [resolvable:$true] %s53_s7 }
   0xf   :  { %36 = dma.hbm_to_vmem [thread:$0]  %s29_s19, 1024, %s31_s22, [#allocation5], %s994_s20, %s994_s20, %s995_s3  }
  0x10   :  { %s76_s26 = sshll.u32 %s1314_s5, 4  ;;  %s997_s27 = smov [#allocation9]   ;;  %s77_s26 = int_to_ptr.hbm [resolvable:$true] %s76_s26 }
  0x11   :  { %s55_s28 = sshll.u32 %s997_s27, 4  ;;  %s998_s29 = smov [#allocation12]   ;;  %s56_s28 = int_to_ptr.vmem [resolvable:$true] %s55_s28 }
  0x12   :  { %58 = dma.hbm_to_vmem [thread:$0]  %s54_s7, 128, %s56_s28, [#allocation8]  }
  0x13   :  { %s78_s30 = sshll.u32 %s998_s29, 4  ;;  %s104_s2 = sshll.u32 %s1317_s8, 4  ;;  %s79_s30 = int_to_ptr.vmem [resolvable:$true] %s78_s30  ;;  %s105_s2 = int_to_ptr.hbm [resolvable:$true] %s104_s2 }
  0x14   :  { %84 = dma.hbm_to_vmem [thread:$0]  %s77_s26, 2048, %s79_s30, [#allocation11], %s994_s20, %s994_s20, %s995_s3  }
  0x15   :  { %s999_s15 = smov [#allocation15]  }
  0x16   :  { %s106_s1 = sshll.u32 %s999_s15, 4  ;;  %s107_s1 = int_to_ptr.vmem [resolvable:$true] %s106_s1 }
  0x17   :  { %112 = dma.hbm_to_vmem [thread:$0]  %s105_s2, 2048, %s107_s1, [#allocation14], %s994_s20, %s994_s20, %s995_s3  }
  0x18   :  { %979 = dma.done.wait [#allocation5], 1024  }
  0x19   :  { %980 = vsyncadd [#allocation5], 4294966272 }
  0x1a   :  { %981 = dma.done.wait [#allocation8], 256  }
  0x1b   :  { %982 = vsyncadd [#allocation8], 4294967040 }
  0x1c   :  { %983 = dma.done.wait [#allocation11], 2176  }
  0x1d   :  { %984 = vsyncadd [#allocation11], 4294965120 }
  0x1e   :  { %985 = dma.done.wait [#allocation14], 4096  }
  0x1f   :  { %986 = vsyncadd [#allocation14], 4294963200  ;;  %v274_v0 = vld [vmem:[#allocation13 + $0x78] sm:$0xff]  ;;  %v273_v2 = vld [vmem:[#allocation13 + $0x70] sm:$0xff]  ;;  %vm164_vm0 = vcmask 64512   ;;  %s653_s21 = sshll.u32 %s1319_s10, 4  ;;  %s654_s21 = int_to_ptr.hbm [resolvable:$true] %s653_s21 }
  0x20   :  { %v1101_v1 = vld [vmem:[#allocation12 + $0x78] sm:$0xff]  ;;  %275 = vmatpush.msra.mxu1 %v274_v0  ;;  %v1104_v3 = vld [vmem:[#allocation12 + $0x70] sm:$0xff]  ;;  %v272_v4 = vld [vmem:[#allocation13 + $0x68] sm:$0xff]  ;;  %s1001_s22 = smov [#allocation17]   ;;  %s667_s0 = sshll.u32 %s1320_s11, 4  ;;  %s668_s0 = int_to_ptr.hbm [resolvable:$true] %s667_s0 }
  0x21   :  { %335 = vmatpush.msra.mxu3 %v1101_v1  ;;  %v1106_v5 = vld [vmem:[#allocation12 + $0x68] sm:$0xff]  ;;  %299 = vmatpush.msra.mxu2 %v1101_v1  ;;  %v271_v6 = vld [vmem:[#allocation13 + $0x60] sm:$0xff]  ;;  %v270_v8 = vld [vmem:[#allocation13 + $0x58] sm:$0xff]  ;;  %s665_s23 = sshll.u32 %s1001_s22, 4  ;;  %s1002_s26 = smov [#allocation19]   ;;  %s666_s23 = int_to_ptr.vmem [resolvable:$true] %s665_s23 }
  0x22   :  { %276 = vmatpush.msra.mxu1 %v273_v2  ;;  %v1110_v7 = vld [vmem:[#allocation12 + $0x60] sm:$0xff]  ;;  %v1114_v9 = vld [vmem:[#allocation12 + $0x58] sm:$0xff]  ;;  %v269_v10 = vld [vmem:[#allocation13 + $0x50] sm:$0xff]  ;;  %s676_s27 = sshll.u32 %s1002_s26, 4  ;;  %s678_s29 = sshll.u32 %s1321_s12, 4  ;;  %s677_s27 = int_to_ptr.vmem [resolvable:$true] %s676_s27  ;;  %s679_s29 = int_to_ptr.hbm [resolvable:$true] %s678_s29 }
  0x23   :  { %336 = vmatpush.msra.mxu3 %v1104_v3  ;;  %300 = vmatpush.msra.mxu2 %v1104_v3  ;;  %v1118_v11 = vld [vmem:[#allocation12 + $0x50] sm:$0xff]  ;;  %v159_v12 = vld [vmem:[#allocation10] sm:$0xff]  ;;  %v268_v13 = vld [vmem:[#allocation13 + $0x48] sm:$0xff] }
  0x24   :  { %277 = vmatpush.msra.mxu1 %v272_v4  ;;  %v1122_v14 = vld [vmem:[#allocation12 + $0x48] sm:$0xff]  ;;  %204 = vmatpush.msra.mxu0 %v159_v12  ;;  %v267_v16 = vld [vmem:[#allocation13 + $0x40] sm:$0xff]  ;;  %v266_v18 = vld [vmem:[#allocation13 + $0x38] sm:$0xff] }
  0x25   :  { %337 = vmatpush.msra.mxu3 %v1106_v5  ;;  %301 = vmatpush.msra.mxu2 %v1106_v5  ;;  %v151_v15 = vld [vmem:[#allocation4] sm:$0xff]  ;;  %v1126_v17 = vld [vmem:[#allocation12 + $0x40] sm:$0xff]  ;;  %v1131_v19 = vld [vmem:[#allocation12 + $0x38] sm:$0xff] }
  0x26   :  { %278 = vmatpush.msra.mxu1 %v271_v6  ;;  %700 = vmatmul.msk.f32.vlgmr.msra.gmra.mxu0 %vm164_vm0, %v151_v15  ;;  %v265_v20 = vld [vmem:[#allocation13 + $0x30] sm:$0xff]  ;;  %v264_v23 = vld [vmem:[#allocation13 + $0x28] sm:$0xff]  ;;  %v263_v25 = vld [vmem:[#allocation13 + $0x20] sm:$0xff] }
  0x27   :  { %338 = vmatpush.msra.mxu3 %v1110_v7  ;;  %302 = vmatpush.msra.mxu2 %v1110_v7  ;;  %v1136_v21 = vld [vmem:[#allocation12 + $0x30] sm:$0xff]  ;;  %v1141_v24 = vld [vmem:[#allocation12 + $0x28] sm:$0xff]  ;;  %v1146_v26 = vld [vmem:[#allocation12 + $0x20] sm:$0xff] }
  0x28   :  { %279 = vmatpush.msra.mxu1 %v270_v8  ;;  %487 = vmatpush.msrb.mxu0 %v1101_v1  ;;  %v152_v22 = vld [vmem:[#allocation4 + $0x8] sm:$0xff]  ;;  %v262_v27 = vld [vmem:[#allocation13 + $0x18] sm:$0xff]  ;;  %v260_v31 = vld [vmem:[#allocation13 + $0x8] sm:$0xff] }
  0x29   :  { %339 = vmatpush.msra.mxu3 %v1114_v9  ;;  %303 = vmatpush.msra.mxu2 %v1114_v9  ;;  %v1151_v28 = vld [vmem:[#allocation12 + $0x18] sm:$0xff]  ;;  %v261_v29 = vld [vmem:[#allocation13 + $0x10] sm:$0xff]  ;;  %v1161_v32 = vld [vmem:[#allocation12 + $0x8] sm:$0xff] }
  0x2a   :  { %280 = vmatpush.msra.mxu1 %v269_v10  ;;  %488 = vmatpush.msrb.mxu0 %v1104_v3  ;;  %v1156_v30 = vld [vmem:[#allocation12 + $0x10] sm:$0xff]  ;;  %v259_v33 = vld [vmem:[#allocation13] sm:$0xff]  ;;  %v147_v36 = vld [vmem:[#allocation7] sm:$0xff] }
  0x2b   :  { %340 = vmatpush.msra.mxu3 %v1118_v11  ;;  %304 = vmatpush.msra.mxu2 %v1118_v11  ;;  %v1166_v34 = vld [vmem:[#allocation12] sm:$0xff]  ;;  %v258_v35 = vld [vmem:[#allocation9] sm:$0xff]  ;;  %v153_v37 = vld [vmem:[#allocation4 + $0x10] sm:$0xff] }
  0x2c   :  { %281 = vmatpush.msra.mxu1 %v268_v13  ;;  %489 = vmatpush.msrb.mxu0 %v1106_v5  ;;  %v154_v38 = vld [vmem:[#allocation4 + $0x18] sm:$0xff]  ;;  %v155_v40 = vld [vmem:[#allocation4 + $0x20] sm:$0xff]  ;;  %v156_v54 = vld [vmem:[#allocation4 + $0x28] sm:$0xff] }
  0x2d   :  { %341 = vmatpush.msra.mxu3 %v1122_v14  ;;  %305 = vmatpush.msra.mxu2 %v1122_v14  ;;  %v1268_v41 = vld [vmem:[%s1313_s4] ss:$0 sm:$0xff]  ;;  %v157_v55 = vld [vmem:[#allocation4 + $0x30] sm:$0xff]  ;;  %v158_v56 = vld [vmem:[#allocation4 + $0x38] sm:$0xff]  ;;  %s1000_s4 = smov [#allocation16]  }
  0x2e   :  { %282 = vmatpush.msra.mxu1 %v267_v16  ;;  %701 = vmatmul.msk.f32.gmra.mxu0 %vm164_vm0, %v152_v22  ;;  %v1275_v46 = vld [vmem:[%s1315_s6] ss:$0 sm:$0xff]  ;;  %v621_v8 = vld [vmem:[#allocation15 + $0x78] sm:$0xff]  ;;  %v616_v13 = vld [vmem:[#allocation15 + $0x50] sm:$0xff]  ;;  %s651_s6 = sshll.u32 %s1000_s4, 4  ;;  %s652_s6 = int_to_ptr.vmem [resolvable:$true] %s651_s6 }
  0x2f   :  { %342 = vmatpush.msra.mxu3 %v1126_v17  ;;  %306 = vmatpush.msra.mxu2 %v1126_v17  ;;  %v619_v10 = vld [vmem:[#allocation15 + $0x68] sm:$0xff]  ;;  %v617_v12 = vld [vmem:[#allocation15 + $0x58] sm:$0xff]  ;;  %v612_v22 = vld [vmem:[#allocation15 + $0x30] sm:$0xff] }
  0x30   :  { %283 = vmatpush.msra.mxu1 %v266_v18  ;;  %490 = vmatpush.msrb.mxu0 %v1110_v7  ;;  %v615_v15 = vld [vmem:[#allocation15 + $0x48] sm:$0xff]  ;;  %v614_v18 = vld [vmem:[#allocation15 + $0x40] sm:$0xff] }
  0x31   :  { %343 = vmatpush.msra.mxu3 %v1131_v19  ;;  %307 = vmatpush.msra.mxu2 %v1131_v19 }
  0x32   :  { %284 = vmatpush.msra.mxu1 %v265_v20  ;;  %491 = vmatpush.msrb.mxu0 %v1114_v9  ;;  %v613_v20 = vld [vmem:[#allocation15 + $0x38] sm:$0xff] }
  0x33   :  { %344 = vmatpush.msra.mxu3 %v1136_v21  ;;  %308 = vmatpush.msra.mxu2 %v1136_v21 }
  0x34   :  { %285 = vmatpush.msra.mxu1 %v264_v23  ;;  %492 = vmatpush.msrb.mxu0 %v1118_v11 }
  0x35   :  { %345 = vmatpush.msra.mxu3 %v1141_v24  ;;  %309 = vmatpush.msra.mxu2 %v1141_v24 }
  0x36   :  { %286 = vmatpush.msra.mxu1 %v263_v25  ;;  %493 = vmatpush.msrb.mxu0 %v1122_v14 }
  0x37   :  { %346 = vmatpush.msra.mxu3 %v1146_v26  ;;  %310 = vmatpush.msra.mxu2 %v1146_v26 }
  0x38   :  { %287 = vmatpush.msra.mxu1 %v262_v27  ;;  %494 = vmatpush.msrb.mxu0 %v1126_v17 }
  0x39   :  { %347 = vmatpush.msra.mxu3 %v1151_v28  ;;  %311 = vmatpush.msra.mxu2 %v1151_v28 }
  0x3a   :  { %288 = vmatpush.msra.mxu1 %v261_v29  ;;  %495 = vmatpush.msrb.mxu0 %v1131_v19  ;;  %v611_v29 = vld [vmem:[#allocation15 + $0x28] sm:$0xff] }
  0x3b   :  { %348 = vmatpush.msra.mxu3 %v1156_v30  ;;  %312 = vmatpush.msra.mxu2 %v1156_v30 }
  0x3c   :  { %289 = vmatpush.msra.mxu1 %v260_v31  ;;  %496 = vmatpush.msrb.mxu0 %v1136_v21  ;;  %v609_v31 = vld [vmem:[#allocation15 + $0x18] sm:$0xff] }
  0x3d   :  { %349 = vmatpush.msra.mxu3 %v1161_v32  ;;  %313 = vmatpush.msra.mxu2 %v1161_v32 }
  0x3e   :  { %290 = vmatpush.msra.mxu1 %v259_v33  ;;  %497 = vmatpush.msrb.mxu0 %v1141_v24  ;;  %v607_v33 = vld [vmem:[#allocation15 + $0x8] sm:$0xff] }
  0x3f   :  { %350 = vmatpush.msra.mxu3 %v1166_v34  ;;  %291 = vmatmul.f32.vlgmr.msra.gmra.mxu1 %v258_v35 }
  0x40   :  { %351 = vmatmul.f32.vlgmr.msra.gmra.mxu3 %v147_v36  ;;  %373 = vmatpush.msrb.mxu1 %v1101_v1 }
  0x41   :  { %314 = vmatpush.msra.mxu2 %v1166_v34  ;;  %449 = vmatpush.msrb.mxu3 %v1101_v1 }
  0x42   :  { %374 = vmatpush.msrb.mxu1 %v1104_v3  ;;  %315 = vmatmul.f32.vlgmr.msra.gmra.mxu2 %v147_v36 }
  0x43   :  { %411 = vmatpush.msrb.mxu2 %v1101_v1  ;;  %450 = vmatpush.msrb.mxu3 %v1104_v3 }
  0x44   :  { %375 = vmatpush.msrb.mxu1 %v1106_v5  ;;  %498 = vmatpush.msrb.mxu0 %v1146_v26 }
  0x45   :  { %412 = vmatpush.msrb.mxu2 %v1104_v3  ;;  %451 = vmatpush.msrb.mxu3 %v1106_v5 }
  0x46   :  { %376 = vmatpush.msrb.mxu1 %v1110_v7  ;;  %499 = vmatpush.msrb.mxu0 %v1151_v28 }
  0x47   :  { %413 = vmatpush.msrb.mxu2 %v1106_v5  ;;  %452 = vmatpush.msrb.mxu3 %v1110_v7 }
  0x48   :  { %377 = vmatpush.msrb.mxu1 %v1114_v9  ;;  %500 = vmatpush.msrb.mxu0 %v1156_v30 }
  0x49   :  { %414 = vmatpush.msrb.mxu2 %v1110_v7  ;;  %453 = vmatpush.msrb.mxu3 %v1114_v9 }
  0x4a   :  { %378 = vmatpush.msrb.mxu1 %v1118_v11  ;;  %501 = vmatpush.msrb.mxu0 %v1161_v32 }
  0x4b   :  { %415 = vmatpush.msrb.mxu2 %v1114_v9  ;;  %454 = vmatpush.msrb.mxu3 %v1118_v11 }
  0x4c   :  { %379 = vmatpush.msrb.mxu1 %v1122_v14  ;;  %502 = vmatpush.msrb.mxu0 %v1166_v34 }
  0x4d   :  { %416 = vmatpush.msrb.mxu2 %v1118_v11  ;;  %455 = vmatpush.msrb.mxu3 %v1122_v14 }
  0x4e   :  { %380 = vmatpush.msrb.mxu1 %v1126_v17  ;;  %702 = vmatmul.msk.f32.gmra.mxu0 %vm164_vm0, %v153_v37 }
  0x4f   :  { %417 = vmatpush.msrb.mxu2 %v1122_v14  ;;  %456 = vmatpush.msrb.mxu3 %v1126_v17 }
  0x50   :  { %381 = vmatpush.msrb.mxu1 %v1131_v19 }
  0x51   :  { %418 = vmatpush.msrb.mxu2 %v1126_v17  ;;  %457 = vmatpush.msrb.mxu3 %v1131_v19 }
  0x52   :  { %382 = vmatpush.msrb.mxu1 %v1136_v21 }
  0x53   :  { %419 = vmatpush.msrb.mxu2 %v1131_v19  ;;  %458 = vmatpush.msrb.mxu3 %v1136_v21 }
  0x54   :  { %383 = vmatpush.msrb.mxu1 %v1141_v24 }
  0x55   :  { %420 = vmatpush.msrb.mxu2 %v1136_v21  ;;  %459 = vmatpush.msrb.mxu3 %v1141_v24 }
  0x56   :  { %384 = vmatpush.msrb.mxu1 %v1146_v26  ;;  %703 = vmatmul.msk.f32.gmra.mxu0 %vm164_vm0, %v154_v38 }
  0x57   :  { %421 = vmatpush.msrb.mxu2 %v1141_v24  ;;  %460 = vmatpush.msrb.mxu3 %v1146_v26 }
  0x58   :  { %385 = vmatpush.msrb.mxu1 %v1151_v28 }
  0x59   :  { %422 = vmatpush.msrb.mxu2 %v1146_v26  ;;  %461 = vmatpush.msrb.mxu3 %v1151_v28 }
  0x5a   :  { %386 = vmatpush.msrb.mxu1 %v1156_v30 }
  0x5b   :  { %423 = vmatpush.msrb.mxu2 %v1151_v28  ;;  %462 = vmatpush.msrb.mxu3 %v1156_v30 }
  0x5c   :  { %387 = vmatpush.msrb.mxu1 %v1161_v32 }
  0x5d   :  { %424 = vmatpush.msrb.mxu2 %v1156_v30  ;;  %463 = vmatpush.msrb.mxu3 %v1161_v32 }
  0x5e   :  { %388 = vmatpush.msrb.mxu1 %v1166_v34  ;;  %704 = vmatmul.msk.f32.gmra.mxu0 %vm164_vm0, %v155_v40 }
  0x5f   :  { %425 = vmatpush.msrb.mxu2 %v1161_v32  ;;  %464 = vmatpush.msrb.mxu3 %v1166_v34 }
  0x60   :  { %525 = vmatpush.msra.mxu1 %v1101_v1 }
  0x61   :  { %426 = vmatpush.msrb.mxu2 %v1166_v34  ;;  %626 = vmatpush.msra.mxu3 %v621_v8 }
  0x62   :  { %526 = vmatpush.msra.mxu1 %v1104_v3 }
  0x63   :  { %563 = vmatpush.msra.mxu2 %v1101_v1 }
  0x64   :  { %527 = vmatpush.msra.mxu1 %v1106_v5 }
  0x65   :  { %564 = vmatpush.msra.mxu2 %v1104_v3 }
  0x66   :  { %528 = vmatpush.msra.mxu1 %v1110_v7  ;;  %705 = vmatmul.msk.f32.gmra.mxu0 %vm164_vm0, %v156_v54 }
  0x67   :  { %565 = vmatpush.msra.mxu2 %v1106_v5 }
  0x68   :  { %529 = vmatpush.msra.mxu1 %v1114_v9 }
  0x69   :  { %566 = vmatpush.msra.mxu2 %v1110_v7 }
  0x6a   :  { %530 = vmatpush.msra.mxu1 %v1118_v11 }
  0x6b   :  { %567 = vmatpush.msra.mxu2 %v1114_v9  ;;  %v620_v9 = vld [vmem:[#allocation15 + $0x70] sm:$0xff] }
  0x6c   :  { %531 = vmatpush.msra.mxu1 %v1122_v14  ;;  %627 = vmatpush.msra.mxu3 %v620_v9 }
  0x6d   :  { %568 = vmatpush.msra.mxu2 %v1118_v11  ;;  %v618_v11 = vld [vmem:[#allocation15 + $0x60] sm:$0xff] }
  0x6e   :  { %532 = vmatpush.msra.mxu1 %v1126_v17  ;;  %706 = vmatmul.msk.f32.gmra.mxu0 %vm164_vm0, %v157_v55 }
  0x6f   :  { %569 = vmatpush.msra.mxu2 %v1122_v14  ;;  %628 = vmatpush.msra.mxu3 %v619_v10 }
  0x70   :  { %533 = vmatpush.msra.mxu1 %v1131_v19 }
  0x71   :  { %570 = vmatpush.msra.mxu2 %v1126_v17  ;;  %629 = vmatpush.msra.mxu3 %v618_v11 }
  0x72   :  { %534 = vmatpush.msra.mxu1 %v1136_v21 }
  0x73   :  { %571 = vmatpush.msra.mxu2 %v1131_v19  ;;  %630 = vmatpush.msra.mxu3 %v617_v12 }
  0x74   :  { %535 = vmatpush.msra.mxu1 %v1141_v24 }
  0x75   :  { %572 = vmatpush.msra.mxu2 %v1136_v21  ;;  %631 = vmatpush.msra.mxu3 %v616_v13 }
  0x76   :  { %536 = vmatpush.msra.mxu1 %v1146_v26  ;;  %707 = vmatmul.msk.f32.gmra.mxu0 %vm164_vm0, %v158_v56 }
  0x77   :  { %573 = vmatpush.msra.mxu2 %v1141_v24  ;;  %632 = vmatpush.msra.mxu3 %v615_v15 }
  0x78   :  { %537 = vmatpush.msra.mxu1 %v1151_v28 }
  0x79   :  { %574 = vmatpush.msra.mxu2 %v1146_v26  ;;  %633 = vmatpush.msra.mxu3 %v614_v18 }
  0x7a   :  { %538 = vmatpush.msra.mxu1 %v1156_v30 }
  0x7b   :  { %575 = vmatpush.msra.mxu2 %v1151_v28  ;;  %634 = vmatpush.msra.mxu3 %v613_v20 }
  0x7c   :  { %539 = vmatpush.msra.mxu1 %v1161_v32 }
  0x7d   :  { %576 = vmatpush.msra.mxu2 %v1156_v30  ;;  %635 = vmatpush.msra.mxu3 %v612_v22  ;;  %v610_v30 = vld [vmem:[#allocation15 + $0x20] sm:$0xff] }
  0x7e   :  { %540 = vmatpush.msra.mxu1 %v1166_v34 }
  0x7f   :  { %577 = vmatpush.msra.mxu2 %v1161_v32  ;;  %636 = vmatpush.msra.mxu3 %v611_v29  ;;  %v608_v32 = vld [vmem:[#allocation15 + $0x10] sm:$0xff] }
  0x81   :  { %578 = vmatpush.msra.mxu2 %v1166_v34  ;;  %637 = vmatpush.msra.mxu3 %v610_v30  ;;  %v606_v34 = vld [vmem:[#allocation15] sm:$0xff] }
  0x83   :  { %638 = vmatpush.msra.mxu3 %v609_v31 }
  0x85   :  { %639 = vmatpush.msra.mxu3 %v608_v32 }
  0x87   :  { %640 = vmatpush.msra.mxu3 %v607_v33 }
  0x89   :  { %641 = vmatpush.msra.mxu3 %v606_v34 }
  0xa3   :  { %v206_v39 = vpop.f32.mrf.mxu0 }
  0xa4   :  { %v207_v42 = vadd.f32 %v1268_v41, %v206_v39 }
  0xab   :  { %v209_v45 = vpop.f32.mrf.mxu0 }
  0xac   :  { %v210_v47 = vadd.f32 %v1268_v41, %v209_v45 }
  0xbc   :  { %v292_v43 = vpop.f32.mrf.mxu1 }
  0xbd   :  { %v325_v44 = vadd.f32 %v292_v43, %v207_v42 }
  0xbf   :  { %723 = vtanh.f32 %v325_v44 }
  0xc3   :  { %v352_v48 = vpop.f32.mrf.mxu3 }
  0xc4   :  { %v353_v49 = vadd.f32 %v1275_v46, %v352_v48 }
  0xc5   :  { %v724_v50 = vpop.eup %723  ;;  %v316_v52 = vpop.f32.mrf.mxu2 }
  0xc6   :  { %v362_v51 = vadd.f32 %v353_v49, %v210_v47  ;;  %327 = vst [vmem:[#allocation16] sm:$0xff] %v724_v50  ;;  %389 = vmatmul.f32.vlgmr.msrb.gmra.mxu1 %v724_v50 }
  0xc8   :  { %725 = vtanh.f32 %v362_v51 }
  0xcb   :  { %v212_v57 = vpop.f32.mrf.mxu0 }
  0xcc   :  { %v213_v58 = vadd.f32 %v1268_v41, %v212_v57 }
  0xce   :  { %v726_v53 = vpop.eup %725 }
  0xcf   :  { %365 = vst [vmem:[#allocation16 + $0x8] sm:$0xff] %v726_v53  ;;  %427 = vmatmul.f32.vlgmr.msrb.gmra.mxu2 %v726_v53 }
  0xd3   :  { %v215_v62 = vpop.f32.mrf.mxu0 }
  0xd4   :  { %v216_v0 = vadd.f32 %v1268_v41, %v215_v62 }
  0xdb   :  { %v218_v5 = vpop.f32.mrf.mxu0 }
  0xdc   :  { %v219_v16 = vadd.f32 %v1268_v41, %v218_v5 }
  0xe3   :  { %v221_v6 = vpop.f32.mrf.mxu0 }
  0xe4   :  { %v222_v23 = vadd.f32 %v1268_v41, %v221_v6 }
  0xeb   :  { %v224_v7 = vpop.f32.mrf.mxu0 }
  0xec   :  { %v225_v36 = vadd.f32 %v1268_v41, %v224_v7 }
  0xf3   :  { %v227_v14 = vpop.f32.mrf.mxu0 }
  0xf4   :  { %v228_v42 = vadd.f32 %v1268_v41, %v227_v14  ;;  %v722_v41 = vld [vmem:[%s1318_s9] ss:$0 sm:$0xff] }
 0x143   :  { %v390_v59 = vpop.f32.mrf.mxu1 }
 0x144   :  { %v391_v60 = vadd.f32 %v1275_v46, %v390_v59 }
 0x146   :  { %v400_v61 = vadd.f32 %v391_v60, %v213_v58 }
 0x148   :  { %727 = vtanh.f32 %v400_v61 }
 0x14e   :  { %v728_v63 = vpop.eup %727 }
 0x14f   :  { %403 = vst [vmem:[#allocation16 + $0x10] sm:$0xff] %v728_v63  ;;  %465 = vmatmul.f32.vlgmr.msrb.gmra.mxu3 %v728_v63 }
 0x152   :  { %v428_v1 = vpop.f32.mrf.mxu2 }
 0x153   :  { %v429_v2 = vadd.f32 %v1275_v46, %v428_v1 }
 0x155   :  { %v438_v3 = vadd.f32 %v429_v2, %v216_v0 }
 0x157   :  { %729 = vtanh.f32 %v438_v3 }
 0x15d   :  { %v730_v4 = vpop.eup %729 }
 0x15e   :  { %441 = vst [vmem:[#allocation16 + $0x18] sm:$0xff] %v730_v4  ;;  %503 = vmatmul.f32.vlgmr.msrb.gmra.mxu0 %v730_v4 }
 0x1d2   :  { %v466_v17 = vpop.f32.mrf.mxu3 }
 0x1d3   :  { %v467_v19 = vadd.f32 %v1275_v46, %v466_v17 }
 0x1d5   :  { %v476_v21 = vadd.f32 %v467_v19, %v219_v16 }
 0x1d7   :  { %731 = vtanh.f32 %v476_v21 }
 0x1db   :  { %v504_v24 = vpop.f32.mrf.mxu0 }
 0x1dc   :  { %v505_v25 = vadd.f32 %v1275_v46, %v504_v24 }
 0x1dd   :  { %v732_v26 = vpop.eup %731 }
 0x1de   :  { %v514_v27 = vadd.f32 %v505_v25, %v222_v23  ;;  %479 = vst [vmem:[#allocation16 + $0x20] sm:$0xff] %v732_v26  ;;  %541 = vmatmul.f32.vlgmr.msra.gmra.mxu1 %v732_v26 }
 0x1e0   :  { %733 = vtanh.f32 %v514_v27 }
 0x1e6   :  { %v734_v28 = vpop.eup %733 }
 0x1e7   :  { %517 = vst [vmem:[#allocation16 + $0x28] sm:$0xff] %v734_v28  ;;  %579 = vmatmul.f32.vlgmr.msra.gmra.mxu2 %v734_v28 }
 0x25b   :  { %v542_v35 = vpop.f32.mrf.mxu1 }
 0x25c   :  { %v543_v37 = vadd.f32 %v1275_v46, %v542_v35 }
 0x25e   :  { %v552_v38 = vadd.f32 %v543_v37, %v225_v36 }
 0x260   :  { %735 = vtanh.f32 %v552_v38 }
 0x266   :  { %v736_v39 = vpop.eup %735 }
 0x267   :  { %555 = vst [vmem:[#allocation16 + $0x30] sm:$0xff] %v736_v39  ;;  %642 = vmatmul.f32.vlgmr.msra.gmra.mxu3 %v736_v39 }
 0x26a   :  { %v580_v40 = vpop.f32.mrf.mxu2 }
 0x26b   :  { %v581_v43 = vadd.f32 %v1275_v46, %v580_v40 }
 0x26d   :  { %v590_v44 = vadd.f32 %v581_v43, %v228_v42 }
 0x26f   :  { %737 = vtanh.f32 %v590_v44 }
 0x275   :  { %v738_v45 = vpop.eup %737 }
 0x276   :  { %593 = vst [vmem:[#allocation16 + $0x38] sm:$0xff] %v738_v45 }
 0x277   :  { %605 = vst [vmem:[#allocation17] sm:$0xff] %v738_v45  ;;  %659 = dma.vmem_to_hbm [thread:$0]  %s652_s6, 1024, %s654_s21, [#allocation6], %s994_s20, %s994_s20, %s995_s3  }
 0x278   :  { %670 = dma.vmem_to_hbm [thread:$0]  %s666_s23, 128, %s668_s0, [#allocation18]  }
 0x2ea   :  { %v643_v46 = vpop.f32.mrf.mxu3 }
 0x2eb   :  { %v644_v47 = vadd.f32 %v722_v41, %v643_v46 }
 0x2ed   :  { %646 = vst [vmem:[#allocation19] sm:$0xff] %v644_v47 }
 0x2ee   :  { %681 = dma.vmem_to_hbm [thread:$0]  %s677_s27, 128, %s679_s29, [#allocation18]  }
 0x2ef   :  { %987 = dma.done.wait [#allocation6], 1024  }
 0x2f0   :  { %988 = vsyncadd [#allocation6], 4294966272 }
 0x2f1   :  { %989 = dma.done.wait [#allocation18], 256  }
 0x2f2   :  { %990 = vsyncadd [#allocation18], 4294967040 }
 0x2f3   :  { %694 = vsyncpa [#allocation5], 1 }
 0x2f4   :  { %695 = vsyncpa [#allocation8], 1 }
 0x2f5   :  { %696 = vsyncpa [#allocation11], 1 }
 0x2f6   :  { %697 = vsyncpa [#allocation14], 1 }
 0x2f7   :  { %698 = vsyncpa [#allocation6], 1 }
 0x2f8   :  { %699 = vsyncpa [#allocation18], 1 }

// kernel: tpu_custom_call.1
= control target key start
LH: loop header
LB: loop body
LE: loop exit
PB: predicated region body
PF: predicated region fallthrough
CT: control target
= control target key end

     0   :  { %18 = vsyncpa [#allocation5], 0  ;;  %s1309_s0 = inlined_call_operand.hbm [shape: f32[8,8,8], index: 0, kind: input, shape index: {}]   ;;  %s1310_s1 = inlined_call_operand.hbm [shape: f32[8,128], index: 1, kind: input, shape index: {}]   ;;  %s1311_s2 = inlined_call_operand.hbm [shape: f32[8,128], index: 2, kind: input, shape index: {}]   ;;  %s1312_s3 = inlined_call_operand.hbm [shape: f32[8,128], index: 3, kind: input, shape index: {}]   ;;  %s1313_s4 = inlined_call_operand.vmem [shape: f32[1,128], index: 4, kind: input, shape index: {}]   ;;  %s1314_s5 = inlined_call_operand.hbm [shape: f32[128,128], index: 5, kind: input, shape index: {}]   ;;  %s1315_s6 = inlined_call_operand.vmem [shape: f32[1,128], index: 6, kind: input, shape index: {}]   ;;  %s1316_s7 = inlined_call_operand.hbm [shape: f32[128,128], index: 7, kind: input, shape index: {}]   ;;  %s1317_s8 = inlined_call_operand.hbm [shape: f32[128,128], index: 8, kind: input, shape index: {}]   ;;  %s1318_s9 = inlined_call_operand.vmem [shape: f32[1,128], index: 9, kind: input, shape index: {}]   ;;  %s1319_s10 = inlined_call_operand.hbm [shape: f32[8,8,128], index: 10, kind: output, shape index: {0}]   ;;  %s1320_s11 = inlined_call_operand.hbm [shape: f32[8,128], index: 11, kind: output, shape index: {1}]   ;;  %s1321_s12 = inlined_call_operand.hbm [shape: f32[8,128], index: 12, kind: output, shape index: {2}]  }
   0x1   :  { %19 = vsyncpa [#allocation8], 0 }
   0x2   :  { %20 = vsyncpa [#allocation11], 0 }
   0x3   :  { %21 = vsyncpa [#allocation14], 0 }
   0x4   :  { %22 = vsyncpa [#allocation6], 0  ;;  %s42_s23 = sshll.u32 %s1310_s1, 4  ;;  %s43_s23 = int_to_ptr.hbm [resolvable:$true] %s42_s23 }
   0x5   :  { %23 = vsyncpa [#allocation18], 0  ;;  %s991_s24 = smov [#allocation7]   ;;  %s64_s28 = sshll.u32 %s1312_s3, 4  ;;  %s65_s28 = int_to_ptr.hbm [resolvable:$true] %s64_s28 }
   0x6   :  { %s44_s25 = sshll.u32 %s991_s24, 4  ;;  %s992_s29 = smov [#allocation10]   ;;  %s45_s25 = int_to_ptr.vmem [resolvable:$true] %s44_s25 }
   0x7   :  { %47 = dma.hbm_to_vmem [thread:$0]  %s43_s23, 128, %s45_s25, [#allocation8]  }
   0x8   :  { %s66_s30 = sshll.u32 %s992_s29, 4  ;;  %s91_s15 = sshll.u32 %s1316_s7, 4  ;;  %s67_s30 = int_to_ptr.vmem [resolvable:$true] %s66_s30  ;;  %s92_s15 = int_to_ptr.hbm [resolvable:$true] %s91_s15 }
   0x9   :  { %69 = dma.hbm_to_vmem [thread:$0]  %s65_s28, 128, %s67_s30, [#allocation11]  }
   0xa   :  { %s993_s1 = smov [#allocation13]   ;;  %s28_s19 = sshll.u32 %s1309_s0, 4  ;;  %s29_s19 = int_to_ptr.hbm [resolvable:$true] %s28_s19 }
   0xb   :  { %s93_s16 = sshll.u32 %s993_s1, 4  ;;  %s994_s20 = smov 128   ;;  %s94_s16 = int_to_ptr.vmem [resolvable:$true] %s93_s16 }
   0xc   :  { %s995_s3 = smov 8   ;;  %s996_s21 = smov [#allocation4]  }
   0xd   :  { %99 = dma.hbm_to_vmem [thread:$0]  %s92_s15, 2048, %s94_s16, [#allocation14], %s994_s20, %s994_s20, %s995_s3  }
   0xe   :  { %s30_s22 = sshll.u32 %s996_s21, 4  ;;  %s53_s7 = sshll.u32 %s1311_s2, 4  ;;  %s31_s22 = int_to_ptr.vmem [resolvable:$true] %s30_s22  ;;  %s54_s7 = int_to_ptr.hbm [resolvable:$true] %s53_s7 }
   0xf   :  { %36 = dma.hbm_to_vmem [thread:$0]  %s29_s19, 1024, %s31_s22, [#allocation5], %s994_s20, %s994_s20, %s995_s3  }
  0x10   :  { %s76_s26 = sshll.u32 %s1314_s5, 4  ;;  %s997_s27 = smov [#allocation9]   ;;  %s77_s26 = int_to_ptr.hbm [resolvable:$true] %s76_s26 }
  0x11   :  { %s55_s28 = sshll.u32 %s997_s27, 4  ;;  %s998_s29 = smov [#allocation12]   ;;  %s56_s28 = int_to_ptr.vmem [resolvable:$true] %s55_s28 }
  0x12   :  { %58 = dma.hbm_to_vmem [thread:$0]  %s54_s7, 128, %s56_s28, [#allocation8]  }
  0x13   :  { %s78_s30 = sshll.u32 %s998_s29, 4  ;;  %s104_s2 = sshll.u32 %s1317_s8, 4  ;;  %s79_s30 = int_to_ptr.vmem [resolvable:$true] %s78_s30  ;;  %s105_s2 = int_to_ptr.hbm [resolvable:$true] %s104_s2 }
  0x14   :  { %84 = dma.hbm_to_vmem [thread:$0]  %s77_s26, 2048, %s79_s30, [#allocation11], %s994_s20, %s994_s20, %s995_s3  }
  0x15   :  { %s999_s15 = smov [#allocation15]  }
  0x16   :  { %s106_s1 = sshll.u32 %s999_s15, 4  ;;  %s107_s1 = int_to_ptr.vmem [resolvable:$true] %s106_s1 }
  0x17   :  { %112 = dma.hbm_to_vmem [thread:$0]  %s105_s2, 2048, %s107_s1, [#allocation14], %s994_s20, %s994_s20, %s995_s3  }
  0x18   :  { %979 = dma.done.wait [#allocation5], 1024  }
  0x19   :  { %980 = vsyncadd [#allocation5], 4294966272 }
  0x1a   :  { %981 = dma.done.wait [#allocation8], 256  }
  0x1b   :  { %982 = vsyncadd [#allocation8], 4294967040 }
  0x1c   :  { %983 = dma.done.wait [#allocation11], 2176  }
  0x1d   :  { %984 = vsyncadd [#allocation11], 4294965120 }
  0x1e   :  { %985 = dma.done.wait [#allocation14], 4096  }
  0x1f   :  { %986 = vsyncadd [#allocation14], 4294963200  ;;  %v274_v0 = vld [vmem:[#allocation13 + $0x78] sm:$0xff]  ;;  %v273_v2 = vld [vmem:[#allocation13 + $0x70] sm:$0xff]  ;;  %vm164_vm0 = vcmask 64512   ;;  %s653_s21 = sshll.u32 %s1319_s10, 4  ;;  %s654_s21 = int_to_ptr.hbm [resolvable:$true] %s653_s21 }
  0x20   :  { %v1101_v1 = vld [vmem:[#allocation12 + $0x78] sm:$0xff]  ;;  %275 = vmatpush.msra.mxu1 %v274_v0  ;;  %v1104_v3 = vld [vmem:[#allocation12 + $0x70] sm:$0xff]  ;;  %v272_v4 = vld [vmem:[#allocation13 + $0x68] sm:$0xff]  ;;  %s1001_s22 = smov [#allocation17]   ;;  %s667_s0 = sshll.u32 %s1320_s11, 4  ;;  %s668_s0 = int_to_ptr.hbm [resolvable:$true] %s667_s0 }
  0x21   :  { %335 = vmatpush.msra.mxu3 %v1101_v1  ;;  %v1106_v5 = vld [vmem:[#allocation12 + $0x68] sm:$0xff]  ;;  %299 = vmatpush.msra.mxu2 %v1101_v1  ;;  %v271_v6 = vld [vmem:[#allocation13 + $0x60] sm:$0xff]  ;;  %v270_v8 = vld [vmem:[#allocation13 + $0x58] sm:$0xff]  ;;  %s665_s23 = sshll.u32 %s1001_s22, 4  ;;  %s1002_s26 = smov [#allocation19]   ;;  %s666_s23 = int_to_ptr.vmem [resolvable:$true] %s665_s23 }
  0x22   :  { %276 = vmatpush.msra.mxu1 %v273_v2  ;;  %v1110_v7 = vld [vmem:[#allocation12 + $0x60] sm:$0xff]  ;;  %v1114_v9 = vld [vmem:[#allocation12 + $0x58] sm:$0xff]  ;;  %v269_v10 = vld [vmem:[#allocation13 + $0x50] sm:$0xff]  ;;  %s676_s27 = sshll.u32 %s1002_s26, 4  ;;  %s678_s29 = sshll.u32 %s1321_s12, 4  ;;  %s677_s27 = int_to_ptr.vmem [resolvable:$true] %s676_s27  ;;  %s679_s29 = int_to_ptr.hbm [resolvable:$true] %s678_s29 }
  0x23   :  { %336 = vmatpush.msra.mxu3 %v1104_v3  ;;  %300 = vmatpush.msra.mxu2 %v1104_v3  ;;  %v1118_v11 = vld [vmem:[#allocation12 + $0x50] sm:$0xff]  ;;  %v159_v12 = vld [vmem:[#allocation10] sm:$0xff]  ;;  %v268_v13 = vld [vmem:[#allocation13 + $0x48] sm:$0xff] }
  0x24   :  { %277 = vmatpush.msra.mxu1 %v272_v4  ;;  %v1122_v14 = vld [vmem:[#allocation12 + $0x48] sm:$0xff]  ;;  %204 = vmatpush.msra.mxu0 %v159_v12  ;;  %v267_v16 = vld [vmem:[#allocation13 + $0x40] sm:$0xff]  ;;  %v266_v18 = vld [vmem:[#allocation13 + $0x38] sm:$0xff] }
  0x25   :  { %337 = vmatpush.msra.mxu3 %v1106_v5  ;;  %301 = vmatpush.msra.mxu2 %v1106_v5  ;;  %v151_v15 = vld [vmem:[#allocation4] sm:$0xff]  ;;  %v1126_v17 = vld [vmem:[#allocation12 + $0x40] sm:$0xff]  ;;  %v1131_v19 = vld [vmem:[#allocation12 + $0x38] sm:$0xff] }
  0x26   :  { %278 = vmatpush.msra.mxu1 %v271_v6  ;;  %700 = vmatmul.msk.f32.vlgmr.msra.gmra.mxu0 %vm164_vm0, %v151_v15  ;;  %v265_v20 = vld [vmem:[#allocation13 + $0x30] sm:$0xff]  ;;  %v264_v23 = vld [vmem:[#allocation13 + $0x28] sm:$0xff]  ;;  %v263_v25 = vld [vmem:[#allocation13 + $0x20] sm:$0xff] }
  0x27   :  { %338 = vmatpush.msra.mxu3 %v1110_v7  ;;  %302 = vmatpush.msra.mxu2 %v1110_v7  ;;  %v1136_v21 = vld [vmem:[#allocation12 + $0x30] sm:$0xff]  ;;  %v1141_v24 = vld [vmem:[#allocation12 + $0x28] sm:$0xff]  ;;  %v1146_v26 = vld [vmem:[#allocation12 + $0x20] sm:$0xff] }
  0x28   :  { %279 = vmatpush.msra.mxu1 %v270_v8  ;;  %487 = vmatpush.msrb.mxu0 %v1101_v1  ;;  %v152_v22 = vld [vmem:[#allocation4 + $0x8] sm:$0xff]  ;;  %v262_v27 = vld [vmem:[#allocation13 + $0x18] sm:$0xff]  ;;  %v260_v31 = vld [vmem:[#allocation13 + $0x8] sm:$0xff] }
  0x29   :  { %339 = vmatpush.msra.mxu3 %v1114_v9  ;;  %303 = vmatpush.msra.mxu2 %v1114_v9  ;;  %v1151_v28 = vld [vmem:[#allocation12 + $0x18] sm:$0xff]  ;;  %v261_v29 = vld [vmem:[#allocation13 + $0x10] sm:$0xff]  ;;  %v1161_v32 = vld [vmem:[#allocation12 + $0x8] sm:$0xff] }
  0x2a   :  { %280 = vmatpush.msra.mxu1 %v269_v10  ;;  %488 = vmatpush.msrb.mxu0 %v1104_v3  ;;  %v1156_v30 = vld [vmem:[#allocation12 + $0x10] sm:$0xff]  ;;  %v259_v33 = vld [vmem:[#allocation13] sm:$0xff]  ;;  %v147_v36 = vld [vmem:[#allocation7] sm:$0xff] }
  0x2b   :  { %340 = vmatpush.msra.mxu3 %v1118_v11  ;;  %304 = vmatpush.msra.mxu2 %v1118_v11  ;;  %v1166_v34 = vld [vmem:[#allocation12] sm:$0xff]  ;;  %v258_v35 = vld [vmem:[#allocation9] sm:$0xff]  ;;  %v153_v37 = vld [vmem:[#allocation4 + $0x10] sm:$0xff] }
  0x2c   :  { %281 = vmatpush.msra.mxu1 %v268_v13  ;;  %489 = vmatpush.msrb.mxu0 %v1106_v5  ;;  %v154_v38 = vld [vmem:[#allocation4 + $0x18] sm:$0xff]  ;;  %v155_v40 = vld [vmem:[#allocation4 + $0x20] sm:$0xff]  ;;  %v156_v54 = vld [vmem:[#allocation4 + $0x28] sm:$0xff] }
  0x2d   :  { %341 = vmatpush.msra.mxu3 %v1122_v14  ;;  %305 = vmatpush.msra.mxu2 %v1122_v14  ;;  %v1268_v41 = vld [vmem:[%s1313_s4] ss:$0 sm:$0xff]  ;;  %v157_v55 = vld [vmem:[#allocation4 + $0x30] sm:$0xff]  ;;  %v158_v56 = vld [vmem:[#allocation4 + $0x38] sm:$0xff]  ;;  %s1000_s4 = smov [#allocation16]  }
  0x2e   :  { %282 = vmatpush.msra.mxu1 %v267_v16  ;;  %701 = vmatmul.msk.f32.gmra.mxu0 %vm164_vm0, %v152_v22  ;;  %v1275_v46 = vld [vmem:[%s1315_s6] ss:$0 sm:$0xff]  ;;  %v621_v8 = vld [vmem:[#allocation15 + $0x78] sm:$0xff]  ;;  %v616_v13 = vld [vmem:[#allocation15 + $0x50] sm:$0xff]  ;;  %s651_s6 = sshll.u32 %s1000_s4, 4  ;;  %s652_s6 = int_to_ptr.vmem [resolvable:$true] %s651_s6 }
  0x2f   :  { %342 = vmatpush.msra.mxu3 %v1126_v17  ;;  %306 = vmatpush.msra.mxu2 %v1126_v17  ;;  %v619_v10 = vld [vmem:[#allocation15 + $0x68] sm:$0xff]  ;;  %v617_v12 = vld [vmem:[#allocation15 + $0x58] sm:$0xff]  ;;  %v612_v22 = vld [vmem:[#allocation15 + $0x30] sm:$0xff] }
  0x30   :  { %283 = vmatpush.msra.mxu1 %v266_v18  ;;  %490 = vmatpush.msrb.mxu0 %v1110_v7  ;;  %v615_v15 = vld [vmem:[#allocation15 + $0x48] sm:$0xff]  ;;  %v614_v18 = vld [vmem:[#allocation15 + $0x40] sm:$0xff] }
  0x31   :  { %343 = vmatpush.msra.mxu3 %v1131_v19  ;;  %307 = vmatpush.msra.mxu2 %v1131_v19 }
  0x32   :  { %284 = vmatpush.msra.mxu1 %v265_v20  ;;  %491 = vmatpush.msrb.mxu0 %v1114_v9  ;;  %v613_v20 = vld [vmem:[#allocation15 + $0x38] sm:$0xff] }
  0x33   :  { %344 = vmatpush.msra.mxu3 %v1136_v21  ;;  %308 = vmatpush.msra.mxu2 %v1136_v21 }
  0x34   :  { %285 = vmatpush.msra.mxu1 %v264_v23  ;;  %492 = vmatpush.msrb.mxu0 %v1118_v11 }
  0x35   :  { %345 = vmatpush.msra.mxu3 %v1141_v24  ;;  %309 = vmatpush.msra.mxu2 %v1141_v24 }
  0x36   :  { %286 = vmatpush.msra.mxu1 %v263_v25  ;;  %493 = vmatpush.msrb.mxu0 %v1122_v14 }
  0x37   :  { %346 = vmatpush.msra.mxu3 %v1146_v26  ;;  %310 = vmatpush.msra.mxu2 %v1146_v26 }
  0x38   :  { %287 = vmatpush.msra.mxu1 %v262_v27  ;;  %494 = vmatpush.msrb.mxu0 %v1126_v17 }
  0x39   :  { %347 = vmatpush.msra.mxu3 %v1151_v28  ;;  %311 = vmatpush.msra.mxu2 %v1151_v28 }
  0x3a   :  { %288 = vmatpush.msra.mxu1 %v261_v29  ;;  %495 = vmatpush.msrb.mxu0 %v1131_v19  ;;  %v611_v29 = vld [vmem:[#allocation15 + $0x28] sm:$0xff] }
  0x3b   :  { %348 = vmatpush.msra.mxu3 %v1156_v30  ;;  %312 = vmatpush.msra.mxu2 %v1156_v30 }
  0x3c   :  { %289 = vmatpush.msra.mxu1 %v260_v31  ;;  %496 = vmatpush.msrb.mxu0 %v1136_v21  ;;  %v609_v31 = vld [vmem:[#allocation15 + $0x18] sm:$0xff] }
  0x3d   :  { %349 = vmatpush.msra.mxu3 %v1161_v32  ;;  %313 = vmatpush.msra.mxu2 %v1161_v32 }
  0x3e   :  { %290 = vmatpush.msra.mxu1 %v259_v33  ;;  %497 = vmatpush.msrb.mxu0 %v1141_v24  ;;  %v607_v33 = vld [vmem:[#allocation15 + $0x8] sm:$0xff] }
  0x3f   :  { %350 = vmatpush.msra.mxu3 %v1166_v34  ;;  %291 = vmatmul.f32.vlgmr.msra.gmra.mxu1 %v258_v35 }
  0x40   :  { %351 = vmatmul.f32.vlgmr.msra.gmra.mxu3 %v147_v36  ;;  %373 = vmatpush.msrb.mxu1 %v1101_v1 }
  0x41   :  { %314 = vmatpush.msra.mxu2 %v1166_v34  ;;  %449 = vmatpush.msrb.mxu3 %v1101_v1 }
  0x42   :  { %374 = vmatpush.msrb.mxu1 %v1104_v3  ;;  %315 = vmatmul.f32.vlgmr.msra.gmra.mxu2 %v147_v36 }
  0x43   :  { %411 = vmatpush.msrb.mxu2 %v1101_v1  ;;  %450 = vmatpush.msrb.mxu3 %v1104_v3 }
  0x44   :  { %375 = vmatpush.msrb.mxu1 %v1106_v5  ;;  %498 = vmatpush.msrb.mxu0 %v1146_v26 }
  0x45   :  { %412 = vmatpush.msrb.mxu2 %v1104_v3  ;;  %451 = vmatpush.msrb.mxu3 %v1106_v5 }
  0x46   :  { %376 = vmatpush.msrb.mxu1 %v1110_v7  ;;  %499 = vmatpush.msrb.mxu0 %v1151_v28 }
  0x47   :  { %413 = vmatpush.msrb.mxu2 %v1106_v5  ;;  %452 = vmatpush.msrb.mxu3 %v1110_v7 }
  0x48   :  { %377 = vmatpush.msrb.mxu1 %v1114_v9  ;;  %500 = vmatpush.msrb.mxu0 %v1156_v30 }
  0x49   :  { %414 = vmatpush.msrb.mxu2 %v1110_v7  ;;  %453 = vmatpush.msrb.mxu3 %v1114_v9 }
  0x4a   :  { %378 = vmatpush.msrb.mxu1 %v1118_v11  ;;  %501 = vmatpush.msrb.mxu0 %v1161_v32 }
  0x4b   :  { %415 = vmatpush.msrb.mxu2 %v1114_v9  ;;  %454 = vmatpush.msrb.mxu3 %v1118_v11 }
  0x4c   :  { %379 = vmatpush.msrb.mxu1 %v1122_v14  ;;  %502 = vmatpush.msrb.mxu0 %v1166_v34 }
  0x4d   :  { %416 = vmatpush.msrb.mxu2 %v1118_v11  ;;  %455 = vmatpush.msrb.mxu3 %v1122_v14 }
  0x4e   :  { %380 = vmatpush.msrb.mxu1 %v1126_v17  ;;  %702 = vmatmul.msk.f32.gmra.mxu0 %vm164_vm0, %v153_v37 }
  0x4f   :  { %417 = vmatpush.msrb.mxu2 %v1122_v14  ;;  %456 = vmatpush.msrb.mxu3 %v1126_v17 }
  0x50   :  { %381 = vmatpush.msrb.mxu1 %v1131_v19 }
  0x51   :  { %418 = vmatpush.msrb.mxu2 %v1126_v17  ;;  %457 = vmatpush.msrb.mxu3 %v1131_v19 }
  0x52   :  { %382 = vmatpush.msrb.mxu1 %v1136_v21 }
  0x53   :  { %419 = vmatpush.msrb.mxu2 %v1131_v19  ;;  %458 = vmatpush.msrb.mxu3 %v1136_v21 }
  0x54   :  { %383 = vmatpush.msrb.mxu1 %v1141_v24 }
  0x55   :  { %420 = vmatpush.msrb.mxu2 %v1136_v21  ;;  %459 = vmatpush.msrb.mxu3 %v1141_v24 }
  0x56   :  { %384 = vmatpush.msrb.mxu1 %v1146_v26  ;;  %703 = vmatmul.msk.f32.gmra.mxu0 %vm164_vm0, %v154_v38 }
  0x57   :  { %421 = vmatpush.msrb.mxu2 %v1141_v24  ;;  %460 = vmatpush.msrb.mxu3 %v1146_v26 }
  0x58   :  { %385 = vmatpush.msrb.mxu1 %v1151_v28 }
  0x59   :  { %422 = vmatpush.msrb.mxu2 %v1146_v26  ;;  %461 = vmatpush.msrb.mxu3 %v1151_v28 }
  0x5a   :  { %386 = vmatpush.msrb.mxu1 %v1156_v30 }
  0x5b   :  { %423 = vmatpush.msrb.mxu2 %v1151_v28  ;;  %462 = vmatpush.msrb.mxu3 %v1156_v30 }
  0x5c   :  { %387 = vmatpush.msrb.mxu1 %v1161_v32 }
  0x5d   :  { %424 = vmatpush.msrb.mxu2 %v1156_v30  ;;  %463 = vmatpush.msrb.mxu3 %v1161_v32 }
  0x5e   :  { %388 = vmatpush.msrb.mxu1 %v1166_v34  ;;  %704 = vmatmul.msk.f32.gmra.mxu0 %vm164_vm0, %v155_v40 }
  0x5f   :  { %425 = vmatpush.msrb.mxu2 %v1161_v32  ;;  %464 = vmatpush.msrb.mxu3 %v1166_v34 }
  0x60   :  { %525 = vmatpush.msra.mxu1 %v1101_v1 }
  0x61   :  { %426 = vmatpush.msrb.mxu2 %v1166_v34  ;;  %626 = vmatpush.msra.mxu3 %v621_v8 }
  0x62   :  { %526 = vmatpush.msra.mxu1 %v1104_v3 }
  0x63   :  { %563 = vmatpush.msra.mxu2 %v1101_v1 }
  0x64   :  { %527 = vmatpush.msra.mxu1 %v1106_v5 }
  0x65   :  { %564 = vmatpush.msra.mxu2 %v1104_v3 }
  0x66   :  { %528 = vmatpush.msra.mxu1 %v1110_v7  ;;  %705 = vmatmul.msk.f32.gmra.mxu0 %vm164_vm0, %v156_v54 }
  0x67   :  { %565 = vmatpush.msra.mxu2 %v1106_v5 }
  0x68   :  { %529 = vmatpush.msra.mxu1 %v1114_v9 }
  0x69   :  { %566 = vmatpush.msra.mxu2 %v1110_v7 }
  0x6a   :  { %530 = vmatpush.msra.mxu1 %v1118_v11 }
  0x6b   :  { %567 = vmatpush.msra.mxu2 %v1114_v9  ;;  %v620_v9 = vld [vmem:[#allocation15 + $0x70] sm:$0xff] }
  0x6c   :  { %531 = vmatpush.msra.mxu1 %v1122_v14  ;;  %627 = vmatpush.msra.mxu3 %v620_v9 }
  0x6d   :  { %568 = vmatpush.msra.mxu2 %v1118_v11  ;;  %v618_v11 = vld [vmem:[#allocation15 + $0x60] sm:$0xff] }
  0x6e   :  { %532 = vmatpush.msra.mxu1 %v1126_v17  ;;  %706 = vmatmul.msk.f32.gmra.mxu0 %vm164_vm0, %v157_v55 }
  0x6f   :  { %569 = vmatpush.msra.mxu2 %v1122_v14  ;;  %628 = vmatpush.msra.mxu3 %v619_v10 }
  0x70   :  { %533 = vmatpush.msra.mxu1 %v1131_v19 }
  0x71   :  { %570 = vmatpush.msra.mxu2 %v1126_v17  ;;  %629 = vmatpush.msra.mxu3 %v618_v11 }
  0x72   :  { %534 = vmatpush.msra.mxu1 %v1136_v21 }
  0x73   :  { %571 = vmatpush.msra.mxu2 %v1131_v19  ;;  %630 = vmatpush.msra.mxu3 %v617_v12 }
  0x74   :  { %535 = vmatpush.msra.mxu1 %v1141_v24 }
  0x75   :  { %572 = vmatpush.msra.mxu2 %v1136_v21  ;;  %631 = vmatpush.msra.mxu3 %v616_v13 }
  0x76   :  { %536 = vmatpush.msra.mxu1 %v1146_v26  ;;  %707 = vmatmul.msk.f32.gmra.mxu0 %vm164_vm0, %v158_v56 }
  0x77   :  { %573 = vmatpush.msra.mxu2 %v1141_v24  ;;  %632 = vmatpush.msra.mxu3 %v615_v15 }
  0x78   :  { %537 = vmatpush.msra.mxu1 %v1151_v28 }
  0x79   :  { %574 = vmatpush.msra.mxu2 %v1146_v26  ;;  %633 = vmatpush.msra.mxu3 %v614_v18 }
  0x7a   :  { %538 = vmatpush.msra.mxu1 %v1156_v30 }
  0x7b   :  { %575 = vmatpush.msra.mxu2 %v1151_v28  ;;  %634 = vmatpush.msra.mxu3 %v613_v20 }
  0x7c   :  { %539 = vmatpush.msra.mxu1 %v1161_v32 }
  0x7d   :  { %576 = vmatpush.msra.mxu2 %v1156_v30  ;;  %635 = vmatpush.msra.mxu3 %v612_v22  ;;  %v610_v30 = vld [vmem:[#allocation15 + $0x20] sm:$0xff] }
  0x7e   :  { %540 = vmatpush.msra.mxu1 %v1166_v34 }
  0x7f   :  { %577 = vmatpush.msra.mxu2 %v1161_v32  ;;  %636 = vmatpush.msra.mxu3 %v611_v29  ;;  %v608_v32 = vld [vmem:[#allocation15 + $0x10] sm:$0xff] }
  0x81   :  { %578 = vmatpush.msra.mxu2 %v1166_v34  ;;  %637 = vmatpush.msra.mxu3 %v610_v30  ;;  %v606_v34 = vld [vmem:[#allocation15] sm:$0xff] }
  0x83   :  { %638 = vmatpush.msra.mxu3 %v609_v31 }
  0x85   :  { %639 = vmatpush.msra.mxu3 %v608_v32 }
  0x87   :  { %640 = vmatpush.msra.mxu3 %v607_v33 }
  0x89   :  { %641 = vmatpush.msra.mxu3 %v606_v34 }
  0xa3   :  { %v206_v39 = vpop.f32.mrf.mxu0 }
  0xa4   :  { %v207_v42 = vadd.f32 %v1268_v41, %v206_v39 }
  0xab   :  { %v209_v45 = vpop.f32.mrf.mxu0 }
  0xac   :  { %v210_v47 = vadd.f32 %v1268_v41, %v209_v45 }
  0xbc   :  { %v292_v43 = vpop.f32.mrf.mxu1 }
  0xbd   :  { %v325_v44 = vadd.f32 %v292_v43, %v207_v42 }
  0xbf   :  { %723 = vtanh.f32 %v325_v44 }
  0xc3   :  { %v352_v48 = vpop.f32.mrf.mxu3 }
  0xc4   :  { %v353_v49 = vadd.f32 %v1275_v46, %v352_v48 }
  0xc5   :  { %v724_v50 = vpop.eup %723  ;;  %v316_v52 = vpop.f32.mrf.mxu2 }
  0xc6   :  { %v362_v51 = vadd.f32 %v353_v49, %v210_v47  ;;  %327 = vst [vmem:[#allocation16] sm:$0xff] %v724_v50  ;;  %389 = vmatmul.f32.vlgmr.msrb.gmra.mxu1 %v724_v50 }
  0xc8   :  { %725 = vtanh.f32 %v362_v51 }
  0xcb   :  { %v212_v57 = vpop.f32.mrf.mxu0 }
  0xcc   :  { %v213_v58 = vadd.f32 %v1268_v41, %v212_v57 }
  0xce   :  { %v726_v53 = vpop.eup %725 }
  0xcf   :  { %365 = vst [vmem:[#allocation16 + $0x8] sm:$0xff] %v726_v53  ;;  %427 = vmatmul.f32.vlgmr.msrb.gmra.mxu2 %v726_v53 }
  0xd3   :  { %v215_v62 = vpop.f32.mrf.mxu0 }
  0xd4   :  { %v216_v0 = vadd.f32 %v1268_v41, %v215_v62 }
  0xdb   :  { %v218_v5 = vpop.f32.mrf.mxu0 }
  0xdc   :  { %v219_v16 = vadd.f32 %v1268_v41, %v218_v5 }
  0xe3   :  { %v221_v6 = vpop.f32.mrf.mxu0 }
  0xe4   :  { %v222_v23 = vadd.f32 %v1268_v41, %v221_v6 }
  0xeb   :  { %v224_v7 = vpop.f32.mrf.mxu0 }
  0xec   :  { %v225_v36 = vadd.f32 %v1268_v41, %v224_v7 }
  0xf3   :  { %v227_v14 = vpop.f32.mrf.mxu0 }
  0xf4   :  { %v228_v42 = vadd.f32 %v1268_v41, %v227_v14  ;;  %v722_v41 = vld [vmem:[%s1318_s9] ss:$0 sm:$0xff] }
 0x143   :  { %v390_v59 = vpop.f32.mrf.mxu1 }
 0x144   :  { %v391_v60 = vadd.f32 %v1275_v46, %v390_v59 }
 0x146   :  { %v400_v61 = vadd.f32 %v391_v60, %v213_v58 }
 0x148   :  { %727 = vtanh.f32 %v400_v61 }
 0x14e   :  { %v728_v63 = vpop.eup %727 }
 0x14f   :  { %403 = vst [vmem:[#allocation16 + $0x10] sm:$0xff] %v728_v63  ;;  %465 = vmatmul.f32.vlgmr.msrb.gmra.mxu3 %v728_v63 }
 0x152   :  { %v428_v1 = vpop.f32.mrf.mxu2 }
 0x153   :  { %v429_v2 = vadd.f32 %v1275_v46, %v428_v1 }
 0x155   :  { %v438_v3 = vadd.f32 %v429_v2, %v216_v0 }
 0x157   :  { %729 = vtanh.f32 %v438_v3 }
 0x15d   :  { %v730_v4 = vpop.eup %729 }
 0x15e   :  { %441 = vst [vmem:[#allocation16 + $0x18] sm:$0xff] %v730_v4  ;;  %503 = vmatmul.f32.vlgmr.msrb.gmra.mxu0 %v730_v4 }
 0x1d2   :  { %v466_v17 = vpop.f32.mrf.mxu3 }
 0x1d3   :  { %v467_v19 = vadd.f32 %v1275_v46, %v466_v17 }
 0x1d5   :  { %v476_v21 = vadd.f32 %v467_v19, %v219_v16 }
 0x1d7   :  { %731 = vtanh.f32 %v476_v21 }
 0x1db   :  { %v504_v24 = vpop.f32.mrf.mxu0 }
 0x1dc   :  { %v505_v25 = vadd.f32 %v1275_v46, %v504_v24 }
 0x1dd   :  { %v732_v26 = vpop.eup %731 }
 0x1de   :  { %v514_v27 = vadd.f32 %v505_v25, %v222_v23  ;;  %479 = vst [vmem:[#allocation16 + $0x20] sm:$0xff] %v732_v26  ;;  %541 = vmatmul.f32.vlgmr.msra.gmra.mxu1 %v732_v26 }
 0x1e0   :  { %733 = vtanh.f32 %v514_v27 }
 0x1e6   :  { %v734_v28 = vpop.eup %733 }
 0x1e7   :  { %517 = vst [vmem:[#allocation16 + $0x28] sm:$0xff] %v734_v28  ;;  %579 = vmatmul.f32.vlgmr.msra.gmra.mxu2 %v734_v28 }
 0x25b   :  { %v542_v35 = vpop.f32.mrf.mxu1 }
 0x25c   :  { %v543_v37 = vadd.f32 %v1275_v46, %v542_v35 }
 0x25e   :  { %v552_v38 = vadd.f32 %v543_v37, %v225_v36 }
 0x260   :  { %735 = vtanh.f32 %v552_v38 }
 0x266   :  { %v736_v39 = vpop.eup %735 }
 0x267   :  { %555 = vst [vmem:[#allocation16 + $0x30] sm:$0xff] %v736_v39  ;;  %642 = vmatmul.f32.vlgmr.msra.gmra.mxu3 %v736_v39 }
 0x26a   :  { %v580_v40 = vpop.f32.mrf.mxu2 }
 0x26b   :  { %v581_v43 = vadd.f32 %v1275_v46, %v580_v40 }
 0x26d   :  { %v590_v44 = vadd.f32 %v581_v43, %v228_v42 }
 0x26f   :  { %737 = vtanh.f32 %v590_v44 }
 0x275   :  { %v738_v45 = vpop.eup %737 }
 0x276   :  { %593 = vst [vmem:[#allocation16 + $0x38] sm:$0xff] %v738_v45 }
 0x277   :  { %605 = vst [vmem:[#allocation17] sm:$0xff] %v738_v45  ;;  %659 = dma.vmem_to_hbm [thread:$0]  %s652_s6, 1024, %s654_s21, [#allocation6], %s994_s20, %s994_s20, %s995_s3  }
 0x278   :  { %670 = dma.vmem_to_hbm [thread:$0]  %s666_s23, 128, %s668_s0, [#allocation18]  }
 0x2ea   :  { %v643_v46 = vpop.f32.mrf.mxu3 }
 0x2eb   :  { %v644_v47 = vadd.f32 %v722_v41, %v643_v46 }
 0x2ed   :  { %646 = vst [vmem:[#allocation19] sm:$0xff] %v644_v47 }
 0x2ee   :  { %681 = dma.vmem_to_hbm [thread:$0]  %s677_s27, 128, %s679_s29, [#allocation18]  }
 0x2ef   :  { %987 = dma.done.wait [#allocation6], 1024  }
 0x2f0   :  { %988 = vsyncadd [#allocation6], 4294966272 }
 0x2f1   :  { %989 = dma.done.wait [#allocation18], 256  }
 0x2f2   :  { %990 = vsyncadd [#allocation18], 4294967040 }
 0x2f3   :  { %694 = vsyncpa [#allocation5], 1 }
 0x2f4   :  { %695 = vsyncpa [#allocation8], 1 }
 0x2f5   :  { %696 = vsyncpa [#allocation11], 1 }
 0x2f6   :  { %697 = vsyncpa [#allocation14], 1 }
 0x2f7   :  { %698 = vsyncpa [#allocation6], 1 }
 0x2f8   :  { %699 = vsyncpa [#allocation18], 1 }

</bundles_post_ra>
